<compile_context>
chip_gen: v7x
topology: tpu7x:2x2x1
jax: 0.10.0
libtpu: 0.0.40
codegen_flags: <defaults>
</compile_context>

<pallas_src>
import functools

import jax
import jax.numpy as jnp
from jax.experimental import pallas as pl
from jax.experimental.pallas import tpu as pltpu

D_CLIP = 768           # CLIP ViT-L/14 joint-embedding dim (implied by 896 + 128 = 1024)
D_EMB = 128            # size of support/target/text/no_time embeds
D_NOIMG = 896          # size of no_target_image_embed
D_OUT = D_CLIP + 2 * D_EMB   # 1024 — feature dim of every assembled token


def _vmem_spec():
    return pl.BlockSpec(memory_space=pltpu.MemorySpace.VMEM)


def _smem_spec():
    return pl.BlockSpec(memory_space=pltpu.MemorySpace.SMEM)


# ------------------------------ fused kernel --------------------------------

def _fused_embedder_kernel(
        # SMEM scalar inputs
        tok_ids_ref, sup_idx_ref, tgt_idx_ref,
        # VMEM: image path (preprocess pre-folded, bf16 weight)
        img_ref, img_w_ref, img_b_ref,
        # VMEM: text path (token table + 1/L-scaled projection)
        tok_tab_ref, txt_w_ref, txt_b_ref,
        # VMEM: learned context embeds + time_encode
        sup_emb_ref, tgt_emb_ref, txt_emb_ref,
        no_time_ref, no_tgt_img_ref,
        time_w_ref, time_b_ref,
        # output
        o_ref,
        *, B, n_support, seq_len):
    n_img = n_support + 1

    # ---- CLIP image encode: single bf16 matmul for support + target rows ----
    enc = jnp.dot(img_ref[...], img_w_ref[...],
                  preferred_element_type=jnp.float32) + img_b_ref[...]
    enc = enc.reshape(B, n_img, D_CLIP)               # rows laid out (b, [sup..., tgt])
    sup_enc = enc[:, :n_support, :]                   # (B, n_support, 768)
    tgt_enc = enc[:, n_support:, :]                   # (B, 1, 768)

    # ---- CLIP text encode: in-kernel gather (SMEM ids) + sum-pool + project ----
    # (1/seq_len mean scale is folded into txt_w, so sum-pool == mean-pool.)
    pooled = []
    for b in range(B):
        s = tok_tab_ref[pl.ds(tok_ids_ref[b, 0], 1), :]
        for l in range(1, seq_len):
            s = s + tok_tab_ref[pl.ds(tok_ids_ref[b, l], 1), :]
        pooled.append(s)
    pooled = jnp.concatenate(pooled, axis=0)          # (B, d_tok)
    z = jnp.dot(pooled, txt_w_ref[...],
                preferred_element_type=jnp.float32) + txt_b_ref[...]
    # FrozenCLIPTextEmbedder(normalize=True): z / ||z||_2 along dim=1
    z = z * jax.lax.rsqrt(jnp.sum(z * z, axis=-1, keepdims=True) + 1e-12)

    # ---- time_encode = nn.Linear(1, 128) driven by SMEM scalars ----
    tw = time_w_ref[...]                              # (1, 128)
    tb = time_b_ref[...]                              # (1, 128)
    sup_time = jnp.concatenate(
        [jnp.concatenate([sup_idx_ref[b, i] * tw + tb
                          for i in range(n_support)], axis=0)[None]
         for b in range(B)], axis=0)                  # (B, n_support, 128)
    tgt_time = jnp.concatenate(
        [(tgt_idx_ref[b] * tw + tb)[None] for b in range(B)],
        axis=0)                                       # (B, 1, 128)

    def bcast(ref, k):
        return jnp.broadcast_to(ref[...][None, :, :], (B, k, ref.shape[-1]))

    # ---- assemble: cat([text, support..., target, to-predict], dim=1) ----
    text_row = jnp.concatenate(
        [z[:, None, :], bcast(txt_emb_ref, 1), bcast(no_time_ref, 1)], axis=-1)
    sup_rows = jnp.concatenate(
        [sup_enc, bcast(sup_emb_ref, n_support), sup_time], axis=-1)
    tgt_row = jnp.concatenate(
        [tgt_enc, bcast(tgt_emb_ref, 1), bcast(no_time_ref, 1)], axis=-1)
    topred_row = jnp.concatenate(
        [bcast(no_tgt_img_ref, 1), tgt_time], axis=-1)

    # single lane-dense full-tile store
    o_ref[...] = jnp.concatenate([text_row, sup_rows, tgt_row, topred_row], axis=1)


# -------------------------------- wrapper ------------------------------------

def _fold_image_preprocess(params, h, w):
    """Fold ((x+1)/2 - mean)/std into the frozen projection weight/bias."""
    # TODO(synk): kornia bicubic 224x224 resize + the pretrained CLIP ViT have
    # no clean Pallas equivalent; replaced with a deterministic synthetic
    # projection encoder on the raw (flattened) pixels.
    mean = jnp.array([0.48145466, 0.4578275, 0.40821073], jnp.float32)
    std = jnp.array([0.26862954, 0.26130258, 0.27577711], jnp.float32)
    hw = h * w
    scale = jnp.repeat(0.5 / std, hw)                 # (3*h*w,)
    shift = jnp.repeat((0.5 - mean) / std, hw)        # (3*h*w,)
    img_w = (scale[:, None] * params["img_w"]).astype(jnp.bfloat16)
    img_b = (shift @ params["img_w"] + params["img_b"]).astype(jnp.float32)
    return img_w, img_b


def rlbench_multi_context_embedder(params, support_images, target_images,
                                   support_idxs, target_idx, text_tokens):
    B, C, H, W = support_images.shape
    n_support = C // 3
    d_img = 3 * H * W
    seq_len = text_tokens.shape[1]
    n_total = 1 + n_support + 1 + 1

    # Frozen-model weight preparation (constant-folded under jit).
    img_w, img_b = _fold_image_preprocess(params, H, W)
    txt_w = params["txt_w"] * (1.0 / seq_len)         # fold mean-pool scale

    # Row-major arrangement: for batch b rows are [support_0..support_{n-1}, target].
    # (Equivalent to torch.concat(split(3,1),0) + stack(split(B,0),1), without
    #  the extra transpose, since the encoder is per-row independent.)
    sup_flat = support_images.reshape(B, n_support, d_img)
    tgt_flat = target_images.reshape(B, 1, d_img)
    img_flat = jnp.concatenate([sup_flat, tgt_flat], axis=1)
    img_flat = img_flat.reshape(B * (n_support + 1), d_img).astype(jnp.bfloat16)

    # TODO(synk): clip.tokenize (string BPE tokenizer) has no Pallas equivalent;
    # the caller supplies integer token ids instead.
    kernel = functools.partial(_fused_embedder_kernel,
                               B=B, n_support=n_support, seq_len=seq_len)

    return pl.pallas_call(
        kernel,
        out_shape=jax.ShapeDtypeStruct((B, n_total, D_OUT), jnp.float32),
        in_specs=[_smem_spec(), _smem_spec(), _smem_spec()] + [_vmem_spec()] * 13,
        out_specs=_vmem_spec(),
    )(text_tokens.astype(jnp.int32),
      support_idxs.astype(jnp.float32),
      target_idx.astype(jnp.float32),
      img_flat, img_w, img_b,
      params["txt_tok_emb"], txt_w, params["txt_b"],
      params["support_embed"], params["target_embed"], params["text_embed"],
      params["no_time_embed"], params["no_target_image_embed"],
      params["time_w"], params["time_b"])


# --------------------------- parameter creation ------------------------------

def init_params(key, *, h=16, w=16, d_tok=128, vocab=256):
    ks = jax.random.split(key, 12)
    d_img = 3 * h * w
    return {
        # synthetic CLIP image encoder (frozen)
        "img_w": jax.random.normal(ks[0], (d_img, D_CLIP), jnp.float32) / jnp.sqrt(d_img),
        "img_b": 0.01 * jax.random.normal(ks[1], (1, D_CLIP), jnp.float32),
        # synthetic CLIP text encoder (frozen)
        "txt_tok_emb": 0.02 * jax.random.normal(ks[2], (vocab, d_tok), jnp.float32),
        "txt_w": jax.random.normal(ks[3], (d_tok, D_CLIP), jnp.float32) / jnp.sqrt(d_tok),
        "txt_b": 0.01 * jax.random.normal(ks[4], (1, D_CLIP), jnp.float32),
        # learned context embeds (module __init__): randn of sizes 128 / 896
        "support_embed": jax.random.normal(ks[5], (1, D_EMB), jnp.float32),
        "target_embed": jax.random.normal(ks[6], (1, D_EMB), jnp.float32),
        "text_embed": jax.random.normal(ks[7], (1, D_EMB), jnp.float32),
        "no_time_embed": jax.random.normal(ks[8], (1, D_EMB), jnp.float32),
        "no_target_image_embed": jax.random.normal(ks[9], (1, D_NOIMG), jnp.float32),
        # time_encode = nn.Linear(1, 128): weight (128,1) stored transposed + bias
        "time_w": jax.random.uniform(ks[10], (1, D_EMB), jnp.float32, -1.0, 1.0),
        "time_b": jax.random.uniform(ks[11], (1, D_EMB), jnp.float32, -1.0, 1.0),
    }


if __name__ == "__main__":
    key = jax.random.PRNGKey(0)
    B, n_support, H, W, L = 2, 2, 16, 16, 8

    params = init_params(key, h=H, w=W)
    kk = jax.random.split(jax.random.PRNGKey(1), 5)
    support_images = jax.random.normal(kk[0], (B, 3 * n_support, H, W), jnp.float32)
    target_images = jax.random.normal(kk[1], (B, 3, H, W), jnp.float32)
    support_idxs = jax.random.uniform(kk[2], (B, n_support), jnp.float32)
    target_idx = jax.random.uniform(kk[3], (B,), jnp.float32)
    text_tokens = jax.random.randint(kk[4], (B, L), 0, 256)

    fwd = jax.jit(functools.partial(rlbench_multi_context_embedder, params))
    out = fwd(support_images, target_images, support_idxs, target_idx, text_tokens)
    jax.block_until_ready(out)

    assert out.shape == (B, 1 + n_support + 1 + 1, D_OUT), out.shape
    assert out.dtype == jnp.float32
    print("KERNEL_OK")
</pallas_src>

<mosaic_0001>
module attributes {stable_mosaic.version = 11 : i64} {
  func.func @_fused_embedder_kernel(%arg0: memref<2x8xi32, #tpu.memory_space<smem>>, %arg1: memref<2x2xf32, #tpu.memory_space<smem>>, %arg2: memref<2xf32, #tpu.memory_space<smem>>, %arg3: memref<6x768xbf16, #tpu.memory_space<vmem>>, %arg4: memref<768x768xbf16, #tpu.memory_space<vmem>>, %arg5: memref<1x768xf32, #tpu.memory_space<vmem>>, %arg6: memref<256x128xf32, #tpu.memory_space<vmem>>, %arg7: memref<128x768xf32, #tpu.memory_space<vmem>>, %arg8: memref<1x768xf32, #tpu.memory_space<vmem>>, %arg9: memref<1x128xf32, #tpu.memory_space<vmem>>, %arg10: memref<1x128xf32, #tpu.memory_space<vmem>>, %arg11: memref<1x128xf32, #tpu.memory_space<vmem>>, %arg12: memref<1x128xf32, #tpu.memory_space<vmem>>, %arg13: memref<1x896xf32, #tpu.memory_space<vmem>>, %arg14: memref<1x128xf32, #tpu.memory_space<vmem>>, %arg15: memref<1x128xf32, #tpu.memory_space<vmem>>, %arg16: memref<2x5x1024xf32, #tpu.memory_space<vmem>>) attributes {dimension_semantics = [], scalar_prefetch = 0 : i64, scratch_operands = 0 : i64, tpu.core_type = #tpu.core_type<tc>} {
    %c0 = arith.constant 0 : index
    %c0_0 = arith.constant 0 : index
    %0 = vector.load %arg3[%c0, %c0_0] : memref<6x768xbf16, #tpu.memory_space<vmem>>, vector<6x768xbf16>
    %c0_1 = arith.constant 0 : index
    %c0_2 = arith.constant 0 : index
    %1 = vector.load %arg4[%c0_1, %c0_2] : memref<768x768xbf16, #tpu.memory_space<vmem>>, vector<768x768xbf16>
    %cst = arith.constant dense<0.000000e+00> : vector<6x768xf32>
    %2 = tpu.matmul %0, %1, %cst {dimension_numbers = #tpu.dot_dimension_numbers<[1], [0], [0], [1], [0, 0, 1, 1], [], []>} : vector<6x768xbf16>, vector<768x768xbf16>, vector<6x768xf32> -> vector<6x768xf32>
    %c0_3 = arith.constant 0 : index
    %c0_4 = arith.constant 0 : index
    %3 = vector.load %arg5[%c0_3, %c0_4] : memref<1x768xf32, #tpu.memory_space<vmem>>, vector<1x768xf32>
    %4 = vector.broadcast %3 : vector<1x768xf32> to vector<6x768xf32>
    %5 = arith.addf %2, %4 : vector<6x768xf32>
    %6 = vector.shape_cast %5 : vector<6x768xf32> to vector<2x3x768xf32>
    %7 = vector.extract_strided_slice %6 {offsets = [0, 0, 0], sizes = [2, 2, 768], strides = [1, 1, 1]} : vector<2x3x768xf32> to vector<2x2x768xf32>
    %8 = vector.extract_strided_slice %6 {offsets = [0, 2, 0], sizes = [2, 1, 768], strides = [1, 1, 1]} : vector<2x3x768xf32> to vector<2x1x768xf32>
    %c0_5 = arith.constant 0 : index
    %c0_6 = arith.constant 0 : index
    %9 = memref.load %arg0[%c0_5, %c0_6] : memref<2x8xi32, #tpu.memory_space<smem>>
    %10 = arith.index_cast %9 : i32 to index
    %c0_7 = arith.constant 0 : index
    %11 = vector.load %arg6[%10, %c0_7] : memref<256x128xf32, #tpu.memory_space<vmem>>, vector<1x128xf32>
    %c0_8 = arith.constant 0 : index
    %c1 = arith.constant 1 : index
    %12 = memref.load %arg0[%c0_8, %c1] : memref<2x8xi32, #tpu.memory_space<smem>>
    %13 = arith.index_cast %12 : i32 to index
    %c0_9 = arith.constant 0 : index
    %14 = vector.load %arg6[%13, %c0_9] : memref<256x128xf32, #tpu.memory_space<vmem>>, vector<1x128xf32>
    %15 = arith.addf %11, %14 : vector<1x128xf32>
    %c0_10 = arith.constant 0 : index
    %c2 = arith.constant 2 : index
    %16 = memref.load %arg0[%c0_10, %c2] : memref<2x8xi32, #tpu.memory_space<smem>>
    %17 = arith.index_cast %16 : i32 to index
    %c0_11 = arith.constant 0 : index
    %18 = vector.load %arg6[%17, %c0_11] : memref<256x128xf32, #tpu.memory_space<vmem>>, vector<1x128xf32>
    %19 = arith.addf %15, %18 : vector<1x128xf32>
    %c0_12 = arith.constant 0 : index
    %c3 = arith.constant 3 : index
    %20 = memref.load %arg0[%c0_12, %c3] : memref<2x8xi32, #tpu.memory_space<smem>>
    %21 = arith.index_cast %20 : i32 to index
    %c0_13 = arith.constant 0 : index
    %22 = vector.load %arg6[%21, %c0_13] : memref<256x128xf32, #tpu.memory_space<vmem>>, vector<1x128xf32>
    %23 = arith.addf %19, %22 : vector<1x128xf32>
    %c0_14 = arith.constant 0 : index
    %c4 = arith.constant 4 : index
    %24 = memref.load %arg0[%c0_14, %c4] : memref<2x8xi32, #tpu.memory_space<smem>>
    %25 = arith.index_cast %24 : i32 to index
    %c0_15 = arith.constant 0 : index
    %26 = vector.load %arg6[%25, %c0_15] : memref<256x128xf32, #tpu.memory_space<vmem>>, vector<1x128xf32>
    %27 = arith.addf %23, %26 : vector<1x128xf32>
    %c0_16 = arith.constant 0 : index
    %c5 = arith.constant 5 : index
    %28 = memref.load %arg0[%c0_16, %c5] : memref<2x8xi32, #tpu.memory_space<smem>>
    %29 = arith.index_cast %28 : i32 to index
    %c0_17 = arith.constant 0 : index
    %30 = vector.load %arg6[%29, %c0_17] : memref<256x128xf32, #tpu.memory_space<vmem>>, vector<1x128xf32>
    %31 = arith.addf %27, %30 : vector<1x128xf32>
    %c0_18 = arith.constant 0 : index
    %c6 = arith.constant 6 : index
    %32 = memref.load %arg0[%c0_18, %c6] : memref<2x8xi32, #tpu.memory_space<smem>>
    %33 = arith.index_cast %32 : i32 to index
    %c0_19 = arith.constant 0 : index
    %34 = vector.load %arg6[%33, %c0_19] : memref<256x128xf32, #tpu.memory_space<vmem>>, vector<1x128xf32>
    %35 = arith.addf %31, %34 : vector<1x128xf32>
    %c0_20 = arith.constant 0 : index
    %c7 = arith.constant 7 : index
    %36 = memref.load %arg0[%c0_20, %c7] : memref<2x8xi32, #tpu.memory_space<smem>>
    %37 = arith.index_cast %36 : i32 to index
    %c0_21 = arith.constant 0 : index
    %38 = vector.load %arg6[%37, %c0_21] : memref<256x128xf32, #tpu.memory_space<vmem>>, vector<1x128xf32>
    %39 = arith.addf %35, %38 : vector<1x128xf32>
    %c1_22 = arith.constant 1 : index
    %c0_23 = arith.constant 0 : index
    %40 = memref.load %arg0[%c1_22, %c0_23] : memref<2x8xi32, #tpu.memory_space<smem>>
    %41 = arith.index_cast %40 : i32 to index
    %c0_24 = arith.constant 0 : index
    %42 = vector.load %arg6[%41, %c0_24] : memref<256x128xf32, #tpu.memory_space<vmem>>, vector<1x128xf32>
    %c1_25 = arith.constant 1 : index
    %c1_26 = arith.constant 1 : index
    %43 = memref.load %arg0[%c1_25, %c1_26] : memref<2x8xi32, #tpu.memory_space<smem>>
    %44 = arith.index_cast %43 : i32 to index
    %c0_27 = arith.constant 0 : index
    %45 = vector.load %arg6[%44, %c0_27] : memref<256x128xf32, #tpu.memory_space<vmem>>, vector<1x128xf32>
    %46 = arith.addf %42, %45 : vector<1x128xf32>
    %c1_28 = arith.constant 1 : index
    %c2_29 = arith.constant 2 : index
    %47 = memref.load %arg0[%c1_28, %c2_29] : memref<2x8xi32, #tpu.memory_space<smem>>
    %48 = arith.index_cast %47 : i32 to index
    %c0_30 = arith.constant 0 : index
    %49 = vector.load %arg6[%48, %c0_30] : memref<256x128xf32, #tpu.memory_space<vmem>>, vector<1x128xf32>
    %50 = arith.addf %46, %49 : vector<1x128xf32>
    %c1_31 = arith.constant 1 : index
    %c3_32 = arith.constant 3 : index
    %51 = memref.load %arg0[%c1_31, %c3_32] : memref<2x8xi32, #tpu.memory_space<smem>>
    %52 = arith.index_cast %51 : i32 to index
    %c0_33 = arith.constant 0 : index
    %53 = vector.load %arg6[%52, %c0_33] : memref<256x128xf32, #tpu.memory_space<vmem>>, vector<1x128xf32>
    %54 = arith.addf %50, %53 : vector<1x128xf32>
    %c1_34 = arith.constant 1 : index
    %c4_35 = arith.constant 4 : index
    %55 = memref.load %arg0[%c1_34, %c4_35] : memref<2x8xi32, #tpu.memory_space<smem>>
    %56 = arith.index_cast %55 : i32 to index
    %c0_36 = arith.constant 0 : index
    %57 = vector.load %arg6[%56, %c0_36] : memref<256x128xf32, #tpu.memory_space<vmem>>, vector<1x128xf32>
    %58 = arith.addf %54, %57 : vector<1x128xf32>
    %c1_37 = arith.constant 1 : index
    %c5_38 = arith.constant 5 : index
    %59 = memref.load %arg0[%c1_37, %c5_38] : memref<2x8xi32, #tpu.memory_space<smem>>
    %60 = arith.index_cast %59 : i32 to index
    %c0_39 = arith.constant 0 : index
    %61 = vector.load %arg6[%60, %c0_39] : memref<256x128xf32, #tpu.memory_space<vmem>>, vector<1x128xf32>
    %62 = arith.addf %58, %61 : vector<1x128xf32>
    %c1_40 = arith.constant 1 : index
    %c6_41 = arith.constant 6 : index
    %63 = memref.load %arg0[%c1_40, %c6_41] : memref<2x8xi32, #tpu.memory_space<smem>>
    %64 = arith.index_cast %63 : i32 to index
    %c0_42 = arith.constant 0 : index
    %65 = vector.load %arg6[%64, %c0_42] : memref<256x128xf32, #tpu.memory_space<vmem>>, vector<1x128xf32>
    %66 = arith.addf %62, %65 : vector<1x128xf32>
    %c1_43 = arith.constant 1 : index
    %c7_44 = arith.constant 7 : index
    %67 = memref.load %arg0[%c1_43, %c7_44] : memref<2x8xi32, #tpu.memory_space<smem>>
    %68 = arith.index_cast %67 : i32 to index
    %c0_45 = arith.constant 0 : index
    %69 = vector.load %arg6[%68, %c0_45] : memref<256x128xf32, #tpu.memory_space<vmem>>, vector<1x128xf32>
    %70 = arith.addf %66, %69 : vector<1x128xf32>
    %71 = tpu.concatenate %39, %70 in 0 : vector<1x128xf32>, vector<1x128xf32> -> vector<2x128xf32>
    %c0_46 = arith.constant 0 : index
    %c0_47 = arith.constant 0 : index
    %72 = vector.load %arg7[%c0_46, %c0_47] : memref<128x768xf32, #tpu.memory_space<vmem>>, vector<128x768xf32>
    %cst_48 = arith.constant dense<0.000000e+00> : vector<2x768xf32>
    %73 = tpu.matmul %71, %72, %cst_48 {dimension_numbers = #tpu.dot_dimension_numbers<[1], [0], [0], [1], [0, 0, 1, 1], [], []>} : vector<2x128xf32>, vector<128x768xf32>, vector<2x768xf32> -> vector<2x768xf32>
    %c0_49 = arith.constant 0 : index
    %c0_50 = arith.constant 0 : index
    %74 = vector.load %arg8[%c0_49, %c0_50] : memref<1x768xf32, #tpu.memory_space<vmem>>, vector<1x768xf32>
    %75 = vector.broadcast %74 : vector<1x768xf32> to vector<2x768xf32>
    %76 = arith.addf %73, %75 : vector<2x768xf32>
    %77 = arith.mulf %76, %76 : vector<2x768xf32>
    %cst_51 = arith.constant dense<0.000000e+00> : vector<2xf32>
    %78 = vector.multi_reduction <add>, %77, %cst_51 [1] : vector<2x768xf32> to vector<2xf32>
    %79 = vector.shape_cast %78 : vector<2xf32> to vector<2x1xf32>
    %cst_52 = arith.constant 9.99999996E-13 : f32
    %80 = vector.broadcast %cst_52 : f32 to vector<2x1xf32>
    %81 = arith.addf %79, %80 : vector<2x1xf32>
    %82 = math.rsqrt %81 : vector<2x1xf32>
    %83 = vector.broadcast %82 : vector<2x1xf32> to vector<2x768xf32>
    %84 = arith.mulf %76, %83 : vector<2x768xf32>
    %c0_53 = arith.constant 0 : index
    %c0_54 = arith.constant 0 : index
    %85 = vector.load %arg14[%c0_53, %c0_54] : memref<1x128xf32, #tpu.memory_space<vmem>>, vector<1x128xf32>
    %c0_55 = arith.constant 0 : index
    %c0_56 = arith.constant 0 : index
    %86 = vector.load %arg15[%c0_55, %c0_56] : memref<1x128xf32, #tpu.memory_space<vmem>>, vector<1x128xf32>
    %c0_57 = arith.constant 0 : index
    %c0_58 = arith.constant 0 : index
    %87 = memref.load %arg1[%c0_57, %c0_58] : memref<2x2xf32, #tpu.memory_space<smem>>
    %88 = vector.broadcast %87 : f32 to vector<1x128xf32>
    %89 = arith.mulf %88, %85 : vector<1x128xf32>
    %90 = arith.addf %89, %86 : vector<1x128xf32>
    %c0_59 = arith.constant 0 : index
    %c1_60 = arith.constant 1 : index
    %91 = memref.load %arg1[%c0_59, %c1_60] : memref<2x2xf32, #tpu.memory_space<smem>>
    %92 = vector.broadcast %91 : f32 to vector<1x128xf32>
    %93 = arith.mulf %92, %85 : vector<1x128xf32>
    %94 = arith.addf %93, %86 : vector<1x128xf32>
    %95 = tpu.concatenate %90, %94 in 0 : vector<1x128xf32>, vector<1x128xf32> -> vector<2x128xf32>
    %96 = vector.shape_cast %95 : vector<2x128xf32> to vector<1x2x128xf32>
    %c1_61 = arith.constant 1 : index
    %c0_62 = arith.constant 0 : index
    %97 = memref.load %arg1[%c1_61, %c0_62] : memref<2x2xf32, #tpu.memory_space<smem>>
    %98 = vector.broadcast %97 : f32 to vector<1x128xf32>
    %99 = arith.mulf %98, %85 : vector<1x128xf32>
    %100 = arith.addf %99, %86 : vector<1x128xf32>
    %c1_63 = arith.constant 1 : index
    %c1_64 = arith.constant 1 : index
    %101 = memref.load %arg1[%c1_63, %c1_64] : memref<2x2xf32, #tpu.memory_space<smem>>
    %102 = vector.broadcast %101 : f32 to vector<1x128xf32>
    %103 = arith.mulf %102, %85 : vector<1x128xf32>
    %104 = arith.addf %103, %86 : vector<1x128xf32>
    %105 = tpu.concatenate %100, %104 in 0 : vector<1x128xf32>, vector<1x128xf32> -> vector<2x128xf32>
    %106 = vector.shape_cast %105 : vector<2x128xf32> to vector<1x2x128xf32>
    %107 = tpu.concatenate %96, %106 in 0 : vector<1x2x128xf32>, vector<1x2x128xf32> -> vector<2x2x128xf32>
    %c0_65 = arith.constant 0 : index
    %108 = memref.load %arg2[%c0_65] : memref<2xf32, #tpu.memory_space<smem>>
    %109 = vector.broadcast %108 : f32 to vector<1x128xf32>
    %110 = arith.mulf %109, %85 : vector<1x128xf32>
    %111 = arith.addf %110, %86 : vector<1x128xf32>
    %112 = vector.shape_cast %111 : vector<1x128xf32> to vector<1x1x128xf32>
    %c1_66 = arith.constant 1 : index
    %113 = memref.load %arg2[%c1_66] : memref<2xf32, #tpu.memory_space<smem>>
    %114 = vector.broadcast %113 : f32 to vector<1x128xf32>
    %115 = arith.mulf %114, %85 : vector<1x128xf32>
    %116 = arith.addf %115, %86 : vector<1x128xf32>
    %117 = vector.shape_cast %116 : vector<1x128xf32> to vector<1x1x128xf32>
    %118 = tpu.concatenate %112, %117 in 0 : vector<1x1x128xf32>, vector<1x1x128xf32> -> vector<2x1x128xf32>
    %119 = vector.shape_cast %84 : vector<2x768xf32> to vector<2x1x768xf32>
    %c0_67 = arith.constant 0 : index
    %c0_68 = arith.constant 0 : index
    %120 = vector.load %arg11[%c0_67, %c0_68] : memref<1x128xf32, #tpu.memory_space<vmem>>, vector<1x128xf32>
    %121 = vector.shape_cast %120 : vector<1x128xf32> to vector<1x1x128xf32>
    %122 = vector.shape_cast %121 : vector<1x1x128xf32> to vector<1x1x128xf32>
    %123 = vector.broadcast %122 : vector<1x1x128xf32> to vector<2x1x128xf32>
    %c0_69 = arith.constant 0 : index
    %c0_70 = arith.constant 0 : index
    %124 = vector.load %arg12[%c0_69, %c0_70] : memref<1x128xf32, #tpu.memory_space<vmem>>, vector<1x128xf32>
    %125 = vector.shape_cast %124 : vector<1x128xf32> to vector<1x1x128xf32>
    %126 = vector.shape_cast %125 : vector<1x1x128xf32> to vector<1x1x128xf32>
    %127 = vector.broadcast %126 : vector<1x1x128xf32> to vector<2x1x128xf32>
    %128 = tpu.concatenate %119, %123, %127 in 2 : vector<2x1x768xf32>, vector<2x1x128xf32>, vector<2x1x128xf32> -> vector<2x1x1024xf32>
    %c0_71 = arith.constant 0 : index
    %c0_72 = arith.constant 0 : index
    %129 = vector.load %arg9[%c0_71, %c0_72] : memref<1x128xf32, #tpu.memory_space<vmem>>, vector<1x128xf32>
    %130 = vector.shape_cast %129 : vector<1x128xf32> to vector<1x1x128xf32>
    %131 = vector.shape_cast %130 : vector<1x1x128xf32> to vector<1x1x128xf32>
    %132 = vector.broadcast %131 : vector<1x1x128xf32> to vector<2x2x128xf32>
    %133 = tpu.concatenate %7, %132, %107 in 2 : vector<2x2x768xf32>, vector<2x2x128xf32>, vector<2x2x128xf32> -> vector<2x2x1024xf32>
    %c0_73 = arith.constant 0 : index
    %c0_74 = arith.constant 0 : index
    %134 = vector.load %arg10[%c0_73, %c0_74] : memref<1x128xf32, #tpu.memory_space<vmem>>, vector<1x128xf32>
    %135 = vector.shape_cast %134 : vector<1x128xf32> to vector<1x1x128xf32>
    %136 = vector.shape_cast %135 : vector<1x1x128xf32> to vector<1x1x128xf32>
    %137 = vector.broadcast %136 : vector<1x1x128xf32> to vector<2x1x128xf32>
    %c0_75 = arith.constant 0 : index
    %c0_76 = arith.constant 0 : index
    %138 = vector.load %arg12[%c0_75, %c0_76] : memref<1x128xf32, #tpu.memory_space<vmem>>, vector<1x128xf32>
    %139 = vector.shape_cast %138 : vector<1x128xf32> to vector<1x1x128xf32>
    %140 = vector.shape_cast %139 : vector<1x1x128xf32> to vector<1x1x128xf32>
    %141 = vector.broadcast %140 : vector<1x1x128xf32> to vector<2x1x128xf32>
    %142 = tpu.concatenate %8, %137, %141 in 2 : vector<2x1x768xf32>, vector<2x1x128xf32>, vector<2x1x128xf32> -> vector<2x1x1024xf32>
    %c0_77 = arith.constant 0 : index
    %c0_78 = arith.constant 0 : index
    %143 = vector.load %arg13[%c0_77, %c0_78] : memref<1x896xf32, #tpu.memory_space<vmem>>, vector<1x896xf32>
    %144 = vector.shape_cast %143 : vector<1x896xf32> to vector<1x1x896xf32>
    %145 = vector.shape_cast %144 : vector<1x1x896xf32> to vector<1x1x896xf32>
    %146 = vector.broadcast %145 : vector<1x1x896xf32> to vector<2x1x896xf32>
    %147 = tpu.concatenate %146, %118 in 2 : vector<2x1x896xf32>, vector<2x1x128xf32> -> vector<2x1x1024xf32>
    %148 = tpu.concatenate %128, %133, %142, %147 in 1 : vector<2x1x1024xf32>, vector<2x2x1024xf32>, vector<2x1x1024xf32>, vector<2x1x1024xf32> -> vector<2x5x1024xf32>
    %c0_79 = arith.constant 0 : index
    %c0_80 = arith.constant 0 : index
    %c0_81 = arith.constant 0 : index
    %149 = vector.load %arg16[%c0_79, %c0_80, %c0_81] : memref<2x5x1024xf32, #tpu.memory_space<vmem>>, vector<2x5x1024xf32>
    tpu.vector_store %arg16[%c0_79, %c0_80, %c0_81], %148 {strides = array<i32>} : memref<2x5x1024xf32, #tpu.memory_space<vmem>>, vector<2x5x1024xf32>,
    return
  }
}

</mosaic_0001>

<bundles_post_ra>
// kernel: rlbench_multi_context_embedder.1
= control target key start
LH: loop header
LB: loop body
LE: loop exit
PB: predicated region body
PF: predicated region fallthrough
CT: control target
= control target key end

     0   :  { %s6033_s0 = inlined_call_operand.vmem [shape: s32[2,8], index: 0, kind: input, shape index: {}]   ;;  %s6034_s1 = inlined_call_operand.vmem [shape: f32[2,2], index: 1, kind: input, shape index: {}]   ;;  %s6035_s2 = inlined_call_operand.vmem [shape: f32[2], index: 2, kind: input, shape index: {}]   ;;  %s6036_s3 = inlined_call_operand.vmem [shape: bf16[6,768], index: 3, kind: input, shape index: {}]   ;;  %s6037_s4 = inlined_call_operand.vmem [shape: bf16[768,768], index: 4, kind: input, shape index: {}]   ;;  %s6038_s5 = inlined_call_operand.vmem [shape: f32[1,768], index: 5, kind: input, shape index: {}]   ;;  %s6039_s6 = inlined_call_operand.vmem [shape: f32[256,128], index: 6, kind: input, shape index: {}]   ;;  %s6040_s7 = inlined_call_operand.vmem [shape: f32[128,768], index: 7, kind: input, shape index: {}]   ;;  %s6041_s8 = inlined_call_operand.vmem [shape: f32[1,768], index: 8, kind: input, shape index: {}]   ;;  %s6042_s9 = inlined_call_operand.vmem [shape: f32[1,128], index: 9, kind: input, shape index: {}]   ;;  %s6043_s10 = inlined_call_operand.vmem [shape: f32[1,128], index: 10, kind: input, shape index: {}]   ;;  %s6044_s11 = inlined_call_operand.vmem [shape: f32[1,128], index: 11, kind: input, shape index: {}]   ;;  %s6045_s12 = inlined_call_operand.vmem [shape: f32[1,128], index: 12, kind: input, shape index: {}]   ;;  %s6046_s13 = inlined_call_operand.vmem [shape: f32[1,896], index: 13, kind: input, shape index: {}]   ;;  %s6047_s14 = inlined_call_operand.vmem [shape: f32[1,128], index: 14, kind: input, shape index: {}]   ;;  %s6048_s15 = inlined_call_operand.vmem [shape: f32[1,128], index: 15, kind: input, shape index: {}]   ;;  %s6049_s16 = inlined_call_operand.vmem [shape: f32[2,5,1024], index: 16, kind: output, shape index: {}]  }
   0x1   :  { %6050 = sst [smem:[#allocation9_spill]] %s6033_s0 }
   0x2   :  { %21 = vsyncpa [#allocation3], 0 }
   0x3   :  { %22 = vsyncpa [#allocation5], 0  ;;  %s39_s23 = sshll.u32 %s6034_s1, 4  ;;  %s6051_s26 = sld [smem:[#allocation9_spill]]  ;;  %s40_s23 = int_to_ptr.vmem [resolvable:$true] %s39_s23 }
   0x4   :  { %s4201_s28 = scalar_lea.vmem %s40_s23, 32  ;;  %p4206_p1 = scmp.lt.s32.totalorder %s40_s23, %s40_s23 }
   0x5   :  { %p4202_p0 = scmp.ne.s32.totalorder %s40_s23, %s4201_s28  ;;  %p4207_p2 = scmp.lt.s32.totalorder %s4201_s28, %s4201_s28 }
   0x7   :  { %p4208_p3 = por %p4207_p2, %p4206_p1 }
   0x9   :  { %s29_s27 = sshll.u32 %s6051_s26, 4  ;;  %p4209_p4 = pnand %p4208_p3, %p4202_p0  ;;  %s30_s27 = int_to_ptr.vmem [resolvable:$true] %s29_s27 }
   0xb   :  { %4212 = shalt.err (!%p4209_p4)
}
   0xc   :  { %s4241_s29 = smov [#allocation4]   ;;  %s4213_s30 = scalar_lea.vmem %s30_s27, 32 }
   0xd   :  { %42 = dma.vmem_to_smem %s40_s23, 32, %s4241_s29, [#allocation5]  }
   0xe   :  { %p4214_p5 = scmp.ne.s32.totalorder %s30_s27, %s4213_s30  ;;  %p4218_p6 = scmp.lt.s32.totalorder %s30_s27, %s30_s27 }
   0xf   :  { %p4219_p7 = scmp.lt.s32.totalorder %s4213_s30, %s4213_s30 }
  0x11   :  { %p4220_p8 = por %p4219_p7, %p4218_p6 }
  0x13   :  { %p4221_p9 = pnand %p4220_p8, %p4214_p5 }
  0x15   :  { %4224 = shalt.err (!%p4221_p9)
}
  0x16   :  { %s4242_s1 = smov [#allocation2]   ;;  %s49_s18 = sshll.u32 %s6035_s2, 4  ;;  %s50_s18 = int_to_ptr.vmem [resolvable:$true] %s49_s18 }
  0x17   :  { %32 = dma.vmem_to_smem %s30_s27, 32, %s4242_s1, [#allocation3]  }
  0x18   :  { %s4225_s19 = scalar_lea.vmem %s50_s18, 16  ;;  %p4230_p11 = scmp.lt.s32.totalorder %s50_s18, %s50_s18 }
  0x19   :  { %p4226_p10 = scmp.ne.s32.totalorder %s50_s18, %s4225_s19  ;;  %p4231_p12 = scmp.lt.s32.totalorder %s4225_s19, %s4225_s19 }
  0x1b   :  { %p4232_p13 = por %p4231_p12, %p4230_p11 }
  0x1d   :  { %p4233_p0 = pnand %p4232_p13, %p4226_p10 }
  0x1f   :  { %4236 = shalt.err (!%p4233_p0)
}
  0x20   :  { %s4243_s20 = smov [#allocation6]  }
  0x21   :  { %52 = dma.vmem_to_smem %s50_s18, 16, %s4243_s20, [#allocation5]  }
  0x22   :  { %4237 = dma.done.wait [#allocation3], 32  }
  0x23   :  { %4238 = vsyncadd [#allocation3], 4294967264 }
  0x24   :  { %4239 = dma.done.wait [#allocation5], 48  }
  0x25   :  { %4240 = vsyncadd [#allocation5], 4294967248 }
  0x26   :  { %88 = sfence }
  0x27   :  { %v3760_v0 = vld [vmem:[%s6037_s4 + $0x4] ss:$24 sps:$4 sm:$0xff]   ;;  %v3764_v2 = vld [vmem:[%s6037_s4] ss:$24 sps:$4 sm:$0xff]   ;;  %v3766_v4 = vld [vmem:[%s6037_s4 + $0x34] ss:$24 sps:$4 sm:$0xff]  }
  0x28   :  { %v3762_v1 = vld [vmem:[%s6037_s4 + $0x304] ss:$24 sps:$4 sm:$0xff]   ;;  %1873 = vmatprep.subr.bf16.mxu1 %v3760_v0  ;;  %v3765_v3 = vld [vmem:[%s6037_s4 + $0x300] ss:$24 sps:$4 sm:$0xff]   ;;  %v3768_v5 = vld [vmem:[%s6037_s4 + $0x334] ss:$24 sps:$4 sm:$0xff]  }
  0x29   :  { %1914 = vmatprep.subr.bf16.mxu0 %v3762_v1  ;;  %1874 = vmatpush1.bf16.msra.mxu1 %v3764_v2  ;;  %v3770_v6 = vld [vmem:[%s6037_s4 + $0x30] ss:$24 sps:$4 sm:$0xff]   ;;  %v3772_v8 = vld [vmem:[%s6037_s4 + $0x64] ss:$24 sps:$4 sm:$0xff]   ;;  %v3776_v10 = vld [vmem:[%s6037_s4 + $0x60] ss:$24 sps:$4 sm:$0xff]  }
  0x2a   :  { %1915 = vmatpush1.bf16.msra.mxu0 %v3765_v3  ;;  %1875 = vmatprep.subr.bf16.mxu1 %v3766_v4  ;;  %v3771_v7 = vld [vmem:[%s6037_s4 + $0x330] ss:$24 sps:$4 sm:$0xff]   ;;  %v3774_v9 = vld [vmem:[%s6037_s4 + $0x364] ss:$24 sps:$4 sm:$0xff]   ;;  %v3777_v11 = vld [vmem:[%s6037_s4 + $0x360] ss:$24 sps:$4 sm:$0xff]  }
  0x2b   :  { %1916 = vmatprep.subr.bf16.mxu0 %v3768_v5  ;;  %v3778_v12 = vld [vmem:[%s6037_s4 + $0x94] ss:$24 sps:$4 sm:$0xff]   ;;  %v3782_v14 = vld [vmem:[%s6037_s4 + $0x90] ss:$24 sps:$4 sm:$0xff]   ;;  %v3784_v16 = vld [vmem:[%s6037_s4 + $0xc4] ss:$24 sps:$4 sm:$0xff]  }
  0x2c   :  { %v3780_v13 = vld [vmem:[%s6037_s4 + $0x394] ss:$24 sps:$4 sm:$0xff]   ;;  %v3783_v15 = vld [vmem:[%s6037_s4 + $0x390] ss:$24 sps:$4 sm:$0xff]   ;;  %v3786_v17 = vld [vmem:[%s6037_s4 + $0x3c4] ss:$24 sps:$4 sm:$0xff]  }
  0x2d   :  { %1876 = vmatpush1.bf16.msra.mxu1 %v3770_v6  ;;  %v3788_v18 = vld [vmem:[%s6037_s4 + $0xc0] ss:$24 sps:$4 sm:$0xff]   ;;  %v3790_v20 = vld [vmem:[%s6037_s4 + $0xf4] ss:$24 sps:$4 sm:$0xff]   ;;  %v3794_v22 = vld [vmem:[%s6037_s4 + $0xf0] ss:$24 sps:$4 sm:$0xff]  }
  0x2e   :  { %1917 = vmatpush1.bf16.msra.mxu0 %v3771_v7  ;;  %1877 = vmatprep.subr.bf16.mxu1 %v3772_v8  ;;  %v3789_v19 = vld [vmem:[%s6037_s4 + $0x3c0] ss:$24 sps:$4 sm:$0xff]   ;;  %v3792_v21 = vld [vmem:[%s6037_s4 + $0x3f4] ss:$24 sps:$4 sm:$0xff]   ;;  %v3795_v23 = vld [vmem:[%s6037_s4 + $0x3f0] ss:$24 sps:$4 sm:$0xff]  }
  0x2f   :  { %1918 = vmatprep.subr.bf16.mxu0 %v3774_v9  ;;  %v3796_v24 = vld [vmem:[%s6037_s4 + $0x124] ss:$24 sps:$4 sm:$0xff]   ;;  %v3800_v26 = vld [vmem:[%s6037_s4 + $0x120] ss:$24 sps:$4 sm:$0xff]   ;;  %v3802_v28 = vld [vmem:[%s6037_s4 + $0x154] ss:$24 sps:$4 sm:$0xff]  }
  0x30   :  { %v3798_v25 = vld [vmem:[%s6037_s4 + $0x424] ss:$24 sps:$4 sm:$0xff]   ;;  %v3801_v27 = vld [vmem:[%s6037_s4 + $0x420] ss:$24 sps:$4 sm:$0xff]   ;;  %v3804_v29 = vld [vmem:[%s6037_s4 + $0x454] ss:$24 sps:$4 sm:$0xff]  }
  0x31   :  { %1878 = vmatpush1.bf16.msra.mxu1 %v3776_v10  ;;  %v3806_v30 = vld [vmem:[%s6037_s4 + $0x150] ss:$24 sps:$4 sm:$0xff]   ;;  %v3808_v32 = vld [vmem:[%s6037_s4 + $0x184] ss:$24 sps:$4 sm:$0xff]   ;;  %v3812_v34 = vld [vmem:[%s6037_s4 + $0x180] ss:$24 sps:$4 sm:$0xff]  }
  0x32   :  { %1919 = vmatpush1.bf16.msra.mxu0 %v3777_v11  ;;  %1879 = vmatprep.subr.bf16.mxu1 %v3778_v12  ;;  %v3807_v31 = vld [vmem:[%s6037_s4 + $0x450] ss:$24 sps:$4 sm:$0xff]   ;;  %v3810_v33 = vld [vmem:[%s6037_s4 + $0x484] ss:$24 sps:$4 sm:$0xff]   ;;  %v3813_v35 = vld [vmem:[%s6037_s4 + $0x480] ss:$24 sps:$4 sm:$0xff]  }
  0x33   :  { %1920 = vmatprep.subr.bf16.mxu0 %v3780_v13  ;;  %v3814_v36 = vld [vmem:[%s6037_s4 + $0x1b4] ss:$24 sps:$4 sm:$0xff]   ;;  %v3818_v38 = vld [vmem:[%s6037_s4 + $0x1b0] ss:$24 sps:$4 sm:$0xff]   ;;  %v3820_v40 = vld [vmem:[%s6037_s4 + $0x1e4] ss:$24 sps:$4 sm:$0xff]  }
  0x34   :  { %v3816_v37 = vld [vmem:[%s6037_s4 + $0x4b4] ss:$24 sps:$4 sm:$0xff]   ;;  %v3819_v39 = vld [vmem:[%s6037_s4 + $0x4b0] ss:$24 sps:$4 sm:$0xff]   ;;  %v3822_v41 = vld [vmem:[%s6037_s4 + $0x4e4] ss:$24 sps:$4 sm:$0xff]  }
  0x35   :  { %1880 = vmatpush1.bf16.msra.mxu1 %v3782_v14  ;;  %v3824_v42 = vld [vmem:[%s6037_s4 + $0x1e0] ss:$24 sps:$4 sm:$0xff]   ;;  %v3826_v44 = vld [vmem:[%s6037_s4 + $0x214] ss:$24 sps:$4 sm:$0xff]   ;;  %v3830_v49 = vld [vmem:[%s6037_s4 + $0x210] ss:$24 sps:$4 sm:$0xff]  }
  0x36   :  { %1921 = vmatpush1.bf16.msra.mxu0 %v3783_v15  ;;  %1881 = vmatprep.subr.bf16.mxu1 %v3784_v16  ;;  %v3825_v43 = vld [vmem:[%s6037_s4 + $0x4e0] ss:$24 sps:$4 sm:$0xff]   ;;  %v3828_v45 = vld [vmem:[%s6037_s4 + $0x514] ss:$24 sps:$4 sm:$0xff]   ;;  %v3831_v50 = vld [vmem:[%s6037_s4 + $0x510] ss:$24 sps:$4 sm:$0xff]  }
  0x37   :  { %1922 = vmatprep.subr.bf16.mxu0 %v3786_v17  ;;  %v89_v46 = vld [vmem:[%s6036_s3] sm:$0x77]  ;;  %v90_v48 = vld [vmem:[%s6036_s3 + $0x8] sm:$0x77]  ;;  %v3871_v11 = vld [vmem:[%s6037_s4 + $0x3c] ss:$24 sps:$4 sm:$0xff]  }
  0x38   :  { %v4481_v47 = vcombine.high %v89_v46, %v89_v46  ;;  %v4492_v51 = vcombine.high %v90_v48, %v90_v48  ;;  %v3832_v52 = vld [vmem:[%s6037_s4 + $0x244] ss:$24 sps:$4 sm:$0xff]   ;;  %v3836_v54 = vld [vmem:[%s6037_s4 + $0x240] ss:$24 sps:$4 sm:$0xff]   ;;  %v3838_v56 = vld [vmem:[%s6037_s4 + $0x274] ss:$24 sps:$4 sm:$0xff]   ;;  %v4550_v6 = vcombine.low %v89_v46, %v89_v46  ;;  %v4552_v7 = vcombine.low %v90_v48, %v90_v48 }
  0x39   :  { %1882 = vmatpush1.bf16.msra.mxu1 %v3788_v18  ;;  %v3834_v53 = vld [vmem:[%s6037_s4 + $0x544] ss:$24 sps:$4 sm:$0xff]   ;;  %v3837_v55 = vld [vmem:[%s6037_s4 + $0x540] ss:$24 sps:$4 sm:$0xff]   ;;  %v3840_v57 = vld [vmem:[%s6037_s4 + $0x574] ss:$24 sps:$4 sm:$0xff]  }
  0x3a   :  { %1923 = vmatpush1.bf16.msra.mxu0 %v3789_v19  ;;  %1883 = vmatprep.subr.bf16.mxu1 %v3790_v20  ;;  %v3842_v58 = vld [vmem:[%s6037_s4 + $0x270] ss:$24 sps:$4 sm:$0xff]   ;;  %v3844_v60 = vld [vmem:[%s6037_s4 + $0x2a4] ss:$24 sps:$4 sm:$0xff]   ;;  %v3848_v62 = vld [vmem:[%s6037_s4 + $0x2a0] ss:$24 sps:$4 sm:$0xff]  }
  0x3b   :  { %1924 = vmatprep.subr.bf16.mxu0 %v3792_v21  ;;  %1905 = vmatprep.mubr.bf16.mxu1 %v4481_v47  ;;  %v3843_v59 = vld [vmem:[%s6037_s4 + $0x570] ss:$24 sps:$4 sm:$0xff]   ;;  %v3846_v61 = vld [vmem:[%s6037_s4 + $0x5a4] ss:$24 sps:$4 sm:$0xff]   ;;  %v3849_v63 = vld [vmem:[%s6037_s4 + $0x5a0] ss:$24 sps:$4 sm:$0xff]  }
  0x3c   :  { %1946 = vmatprep.mubr.bf16.mxu0 %v4492_v51  ;;  %v3850_v0 = vld [vmem:[%s6037_s4 + $0x2d4] ss:$24 sps:$4 sm:$0xff]   ;;  %v3854_v2 = vld [vmem:[%s6037_s4 + $0x2d0] ss:$24 sps:$4 sm:$0xff]   ;;  %v3861_v4 = vld [vmem:[%s6037_s4 + $0x604] ss:$24 sps:$4 sm:$0xff]  }
  0x3d   :  { %1884 = vmatpush1.bf16.msra.mxu1 %v3794_v22  ;;  %v3852_v1 = vld [vmem:[%s6037_s4 + $0x5d4] ss:$24 sps:$4 sm:$0xff]   ;;  %v3855_v3 = vld [vmem:[%s6037_s4 + $0x5d0] ss:$24 sps:$4 sm:$0xff]   ;;  %v3859_v8 = vld [vmem:[%s6037_s4 + $0x600] ss:$24 sps:$4 sm:$0xff]  }
  0x3e   :  { %1925 = vmatpush1.bf16.msra.mxu0 %v3795_v23  ;;  %1885 = vmatprep.subr.bf16.mxu1 %v3796_v24  ;;  %v3864_v5 = vld [vmem:[%s6037_s4 + $0xc] ss:$24 sps:$4 sm:$0xff]   ;;  %v3862_v9 = vld [vmem:[%s6037_s4 + $0x8] ss:$24 sps:$4 sm:$0xff]   ;;  %v3869_v13 = vld [vmem:[%s6037_s4 + $0x38] ss:$24 sps:$4 sm:$0xff]  }
  0x3f   :  { %1926 = vmatprep.subr.bf16.mxu0 %v3798_v25  ;;  %v3868_v10 = vld [vmem:[%s6037_s4 + $0x634] ss:$24 sps:$4 sm:$0xff]   ;;  %v3866_v12 = vld [vmem:[%s6037_s4 + $0x630] ss:$24 sps:$4 sm:$0xff]   ;;  %v3874_v14 = vld [vmem:[%s6037_s4 + $0x664] ss:$24 sps:$4 sm:$0xff]  }
  0x40   :  { %v3877_v15 = vld [vmem:[%s6037_s4 + $0x6c] ss:$24 sps:$4 sm:$0xff]   ;;  %v3872_v16 = vld [vmem:[%s6037_s4 + $0x660] ss:$24 sps:$4 sm:$0xff]   ;;  %v3883_v19 = vld [vmem:[%s6037_s4 + $0x9c] ss:$24 sps:$4 sm:$0xff]  }
  0x41   :  { %1886 = vmatpush1.bf16.msra.mxu1 %v3800_v26  ;;  %v3875_v17 = vld [vmem:[%s6037_s4 + $0x68] ss:$24 sps:$4 sm:$0xff]   ;;  %v3880_v18 = vld [vmem:[%s6037_s4 + $0x694] ss:$24 sps:$4 sm:$0xff]   ;;  %v3881_v21 = vld [vmem:[%s6037_s4 + $0x98] ss:$24 sps:$4 sm:$0xff]  }
  0x42   :  { %1927 = vmatpush1.bf16.msra.mxu0 %v3801_v27  ;;  %1887 = vmatprep.subr.bf16.mxu1 %v3802_v28  ;;  %v3878_v20 = vld [vmem:[%s6037_s4 + $0x690] ss:$24 sps:$4 sm:$0xff]   ;;  %v3886_v22 = vld [vmem:[%s6037_s4 + $0x6c4] ss:$24 sps:$4 sm:$0xff]   ;;  %v3884_v24 = vld [vmem:[%s6037_s4 + $0x6c0] ss:$24 sps:$4 sm:$0xff]  }
  0x43   :  { %1928 = vmatprep.subr.bf16.mxu0 %v3804_v29  ;;  %v3889_v23 = vld [vmem:[%s6037_s4 + $0xcc] ss:$24 sps:$4 sm:$0xff]   ;;  %v3887_v25 = vld [vmem:[%s6037_s4 + $0xc8] ss:$24 sps:$4 sm:$0xff]   ;;  %v3895_v27 = vld [vmem:[%s6037_s4 + $0xfc] ss:$24 sps:$4 sm:$0xff]  }
  0x44   :  { %v3892_v26 = vld [vmem:[%s6037_s4 + $0x6f4] ss:$24 sps:$4 sm:$0xff]   ;;  %v3890_v28 = vld [vmem:[%s6037_s4 + $0x6f0] ss:$24 sps:$4 sm:$0xff]   ;;  %s4914_s18 = sld [smem:[#allocation4]]  ;;  %s4916_s19 = sld [smem:[#allocation4 + $0x1]] }
  0x45   :  { %1888 = vmatpush1.bf16.msra.mxu1 %v3806_v30  ;;  %v3893_v29 = vld [vmem:[%s6037_s4 + $0xf8] ss:$24 sps:$4 sm:$0xff]   ;;  %v3898_v30 = vld [vmem:[%s6037_s4 + $0x724] ss:$24 sps:$4 sm:$0xff]   ;;  %s4921_s22 = sld [smem:[#allocation4 + $0x80]]  ;;  %s4923_s2 = sld [smem:[#allocation4 + $0x81]] }
  0x46   :  { %1929 = vmatpush1.bf16.msra.mxu0 %v3807_v31  ;;  %1889 = vmatprep.subr.bf16.mxu1 %v3808_v32  ;;  %v3901_v31 = vld [vmem:[%s6037_s4 + $0x12c] ss:$24 sps:$4 sm:$0xff]   ;;  %v4632_v32 = vld [vmem:[%s6036_s3 + $0x10] sm:$0x77]  ;;  %s4928_s3 = sld [smem:[#allocation6]]  ;;  %s4930_s25 = sld [smem:[#allocation6 + $0x1]] }
  0x47   :  { %1930 = vmatprep.subr.bf16.mxu0 %v3810_v33  ;;  %v3896_v33 = vld [vmem:[%s6037_s4 + $0x720] ss:$24 sps:$4 sm:$0xff]   ;;  %v3914_v46 = vld [vmem:[%s6037_s4 + $0x7b0] ss:$24 sps:$4 sm:$0xff]   ;;  %vm2429_vm0 = vcmask 1040384   ;;  %vm3243_vm1 = vcmask 1042432  }
  0x48   :  { %v3917_v48 = vld [vmem:[%s6037_s4 + $0x1b8] ss:$24 sps:$4 sm:$0xff]   ;;  %vm3259_vm2 = vcmask 1043456   ;;  %s5191_s26 = sld [smem:[#allocation2 + $0x81]]  ;;  %s5199_s30 = sld [smem:[#allocation2]]  ;;  %vm2778_vm3 = vcmask 1041408  }
  0x49   :  { %1890 = vmatpush1.bf16.msra.mxu1 %v3812_v34  ;;  %v4639_v34 = vcombine.high %v4632_v32, %v4632_v32  ;;  %s5207_s0 = sld [smem:[#allocation2 + $0x1]]  ;;  %s5223_s21 = sld [smem:[#allocation2 + $0x2]] }
  0x4a   :  { %1931 = vmatpush1.bf16.msra.mxu0 %v3813_v35  ;;  %1891 = vmatprep.subr.bf16.mxu1 %v3814_v36  ;;  %v3899_v35 = vld [vmem:[%s6037_s4 + $0x128] ss:$24 sps:$4 sm:$0xff]   ;;  %v3904_v36 = vld [vmem:[%s6037_s4 + $0x754] ss:$24 sps:$4 sm:$0xff]   ;;  %s5239_s17 = sld [smem:[#allocation2 + $0x83]]  ;;  %s5290_s28 = sld [smem:[#allocation2 + $0x4]] }
  0x4b   :  { %1932 = vmatprep.subr.bf16.mxu0 %v3816_v37  ;;  %v3907_v37 = vld [vmem:[%s6037_s4 + $0x15c] ss:$24 sps:$4 sm:$0xff]  }
  0x4d   :  { %1892 = vmatpush1.bf16.msra.mxu1 %v3818_v38  ;;  %v3902_v38 = vld [vmem:[%s6037_s4 + $0x750] ss:$24 sps:$4 sm:$0xff]  }
  0x4e   :  { %1933 = vmatpush1.bf16.msra.mxu0 %v3819_v39  ;;  %1893 = vmatprep.subr.bf16.mxu1 %v3820_v40  ;;  %v3905_v39 = vld [vmem:[%s6037_s4 + $0x158] ss:$24 sps:$4 sm:$0xff]   ;;  %v3910_v40 = vld [vmem:[%s6037_s4 + $0x784] ss:$24 sps:$4 sm:$0xff]   ;;  %s2365_s29 = scalar_lea.vmem %s6039_s6, %s5199_s30  ;;  %s5276_s30 = sld [smem:[#allocation2 + $0x84]] }
  0x4f   :  { %1934 = vmatprep.subr.bf16.mxu0 %v3822_v41  ;;  %v3913_v41 = vld [vmem:[%s6037_s4 + $0x18c] ss:$24 sps:$4 sm:$0xff]  }
  0x50   :  { %s2407_s23 = scalar_lea.vmem %s6039_s6, %s5239_s17  ;;  %s2380_s1 = scalar_lea.vmem %s6039_s6, %s5290_s28 }
  0x51   :  { %1894 = vmatpush1.bf16.msra.mxu1 %v3824_v42  ;;  %v3908_v42 = vld [vmem:[%s6037_s4 + $0x780] ss:$24 sps:$4 sm:$0xff]  }
  0x52   :  { %1935 = vmatpush1.bf16.msra.mxu0 %v3825_v43  ;;  %1895 = vmatprep.subr.bf16.mxu1 %v3826_v44  ;;  %v3911_v43 = vld [vmem:[%s6037_s4 + $0x188] ss:$24 sps:$4 sm:$0xff]   ;;  %v3916_v44 = vld [vmem:[%s6037_s4 + $0x7b4] ss:$24 sps:$4 sm:$0xff]  }
  0x53   :  { %1936 = vmatprep.subr.bf16.mxu0 %v3828_v45  ;;  %v3919_v45 = vld [vmem:[%s6037_s4 + $0x1bc] ss:$24 sps:$4 sm:$0xff]  }
  0x55   :  { %1896 = vmatpush1.bf16.msra.mxu1 %v3830_v49  ;;  %v3922_v49 = vld [vmem:[%s6037_s4 + $0x7e4] ss:$24 sps:$4 sm:$0xff]  }
  0x56   :  { %1937 = vmatpush1.bf16.msra.mxu0 %v3831_v50  ;;  %1897 = vmatprep.subr.bf16.mxu1 %v3832_v52  ;;  %v3925_v50 = vld [vmem:[%s6037_s4 + $0x1ec] ss:$24 sps:$4 sm:$0xff]   ;;  %v3920_v52 = vld [vmem:[%s6037_s4 + $0x7e0] ss:$24 sps:$4 sm:$0xff]  }
  0x57   :  { %1938 = vmatprep.subr.bf16.mxu0 %v3834_v53  ;;  %v3923_v53 = vld [vmem:[%s6037_s4 + $0x1e8] ss:$24 sps:$4 sm:$0xff]  }
  0x59   :  { %1898 = vmatpush1.bf16.msra.mxu1 %v3836_v54  ;;  %v3928_v54 = vld [vmem:[%s6037_s4 + $0x814] ss:$24 sps:$4 sm:$0xff]  }
  0x5a   :  { %1939 = vmatpush1.bf16.msra.mxu0 %v3837_v55  ;;  %1899 = vmatprep.subr.bf16.mxu1 %v3838_v56  ;;  %v3931_v55 = vld [vmem:[%s6037_s4 + $0x21c] ss:$24 sps:$4 sm:$0xff]   ;;  %v3926_v56 = vld [vmem:[%s6037_s4 + $0x810] ss:$24 sps:$4 sm:$0xff]  }
  0x5b   :  { %1940 = vmatprep.subr.bf16.mxu0 %v3840_v57  ;;  %v3929_v57 = vld [vmem:[%s6037_s4 + $0x218] ss:$24 sps:$4 sm:$0xff]  }
  0x5d   :  { %1900 = vmatpush1.bf16.msra.mxu1 %v3842_v58  ;;  %v3934_v58 = vld [vmem:[%s6037_s4 + $0x844] ss:$24 sps:$4 sm:$0xff]  }
  0x5e   :  { %1941 = vmatpush1.bf16.msra.mxu0 %v3843_v59  ;;  %1901 = vmatprep.subr.bf16.mxu1 %v3844_v60  ;;  %v3937_v59 = vld [vmem:[%s6037_s4 + $0x24c] ss:$24 sps:$4 sm:$0xff]   ;;  %v3932_v60 = vld [vmem:[%s6037_s4 + $0x840] ss:$24 sps:$4 sm:$0xff]  }
  0x5f   :  { %1942 = vmatprep.subr.bf16.mxu0 %v3846_v61  ;;  %v3935_v61 = vld [vmem:[%s6037_s4 + $0x248] ss:$24 sps:$4 sm:$0xff]  }
  0x61   :  { %1902 = vmatpush1.bf16.msra.mxu1 %v3848_v62  ;;  %v3940_v62 = vld [vmem:[%s6037_s4 + $0x874] ss:$24 sps:$4 sm:$0xff]  }
  0x62   :  { %1943 = vmatpush1.bf16.msra.mxu0 %v3849_v63  ;;  %1903 = vmatprep.subr.bf16.mxu1 %v3850_v0  ;;  %v3943_v63 = vld [vmem:[%s6037_s4 + $0x27c] ss:$24 sps:$4 sm:$0xff]   ;;  %v3938_v0 = vld [vmem:[%s6037_s4 + $0x870] ss:$24 sps:$4 sm:$0xff]  }
  0x63   :  { %1944 = vmatprep.subr.bf16.mxu0 %v3852_v1  ;;  %v3941_v1 = vld [vmem:[%s6037_s4 + $0x278] ss:$24 sps:$4 sm:$0xff]  }
  0x65   :  { %1904 = vmatpush1.bf16.msra.mxu1 %v3854_v2  ;;  %v3946_v2 = vld [vmem:[%s6037_s4 + $0x8a4] ss:$24 sps:$4 sm:$0xff]  }
  0x66   :  { %1945 = vmatpush1.bf16.msra.mxu0 %v3855_v3  ;;  %1996 = vmatprep.subr.bf16.mxu1 %v3864_v5  ;;  %v3949_v3 = vld [vmem:[%s6037_s4 + $0x2ac] ss:$24 sps:$4 sm:$0xff]   ;;  %v3947_v5 = vld [vmem:[%s6037_s4 + $0x2a8] ss:$24 sps:$4 sm:$0xff]  }
  0x67   :  { %1955 = vmatprep.subr.bf16.mxu0 %v3861_v4  ;;  %v3944_v4 = vld [vmem:[%s6037_s4 + $0x8a0] ss:$24 sps:$4 sm:$0xff]  }
  0x68   :  { %1906 = vmatmul.mubr.bf16.vlgmr.msra.gmra.mrb[0].mxu1 %v4550_v6 }
  0x69   :  { %1947 = vmatmul.mubr.bf16.vlgmr.msra.gmra.mrb[0].mxu0 %v4552_v7  ;;  %1997 = vmatpush1.bf16.msra.mxu1 %v3862_v9  ;;  %v3955_v9 = vld [vmem:[%s6037_s4 + $0x2dc] ss:$24 sps:$4 sm:$0xff]  }
  0x6a   :  { %1956 = vmatpush1.bf16.msra.mxu0 %v3859_v8  ;;  %1998 = vmatprep.subr.bf16.mxu1 %v3871_v11  ;;  %v3952_v8 = vld [vmem:[%s6037_s4 + $0x8d4] ss:$24 sps:$4 sm:$0xff]   ;;  %v3953_v11 = vld [vmem:[%s6037_s4 + $0x2d8] ss:$24 sps:$4 sm:$0xff]  }
  0x6b   :  { %1957 = vmatprep.subr.bf16.mxu0 %v3868_v10  ;;  %2028 = vmatprep.mubr.bf16.mxu1 %v4481_v47  ;;  %v3950_v10 = vld [vmem:[%s6037_s4 + $0x8d0] ss:$24 sps:$4 sm:$0xff]  }
  0x6c   :  { %1987 = vmatprep.mubr.bf16.mxu0 %v4639_v34 }
  0x6d   :  { %1999 = vmatpush1.bf16.msra.mxu1 %v3869_v13  ;;  %v3963_v13 = vld [vmem:[%s6037_s4 + $0x14] ss:$24 sps:$4 sm:$0xff]  }
  0x6e   :  { %1958 = vmatpush1.bf16.msra.mxu0 %v3866_v12  ;;  %2000 = vmatprep.subr.bf16.mxu1 %v3877_v15  ;;  %v3960_v12 = vld [vmem:[%s6037_s4 + $0x30c] ss:$24 sps:$4 sm:$0xff]   ;;  %v3958_v15 = vld [vmem:[%s6037_s4 + $0x308] ss:$24 sps:$4 sm:$0xff]  }
  0x6f   :  { %1959 = vmatprep.subr.bf16.mxu0 %v3874_v14  ;;  %v4761_v14 = vcombine.low %v4632_v32, %v4632_v32  ;;  %v3990_v32 = vld [vmem:[%s6037_s4 + $0x3fc] ss:$24 sps:$4 sm:$0xff]  }
  0x71   :  { %2001 = vmatpush1.bf16.msra.mxu1 %v3875_v17  ;;  %v3966_v17 = vld [vmem:[%s6037_s4 + $0x33c] ss:$24 sps:$4 sm:$0xff]  }
  0x72   :  { %1960 = vmatpush1.bf16.msra.mxu0 %v3872_v16  ;;  %2002 = vmatprep.subr.bf16.mxu1 %v3883_v19  ;;  %v3961_v16 = vld [vmem:[%s6037_s4 + $0x10] ss:$24 sps:$4 sm:$0xff]  }
  0x73   :  { %1961 = vmatprep.subr.bf16.mxu0 %v3880_v18  ;;  %v3969_v18 = vld [vmem:[%s6037_s4 + $0x44] ss:$24 sps:$4 sm:$0xff]   ;;  %v3964_v19 = vld [vmem:[%s6037_s4 + $0x338] ss:$24 sps:$4 sm:$0xff]  }
  0x75   :  { %2003 = vmatpush1.bf16.msra.mxu1 %v3881_v21  ;;  %v3972_v21 = vld [vmem:[%s6037_s4 + $0x36c] ss:$24 sps:$4 sm:$0xff]  }
  0x76   :  { %1962 = vmatpush1.bf16.msra.mxu0 %v3878_v20  ;;  %2004 = vmatprep.subr.bf16.mxu1 %v3889_v23  ;;  %v3967_v20 = vld [vmem:[%s6037_s4 + $0x40] ss:$24 sps:$4 sm:$0xff]  }
  0x77   :  { %1963 = vmatprep.subr.bf16.mxu0 %v3886_v22  ;;  %v3975_v22 = vld [vmem:[%s6037_s4 + $0x74] ss:$24 sps:$4 sm:$0xff]   ;;  %v3970_v23 = vld [vmem:[%s6037_s4 + $0x368] ss:$24 sps:$4 sm:$0xff]  }
  0x79   :  { %2005 = vmatpush1.bf16.msra.mxu1 %v3887_v25  ;;  %v3978_v25 = vld [vmem:[%s6037_s4 + $0x39c] ss:$24 sps:$4 sm:$0xff]  }
  0x7a   :  { %1964 = vmatpush1.bf16.msra.mxu0 %v3884_v24  ;;  %2006 = vmatprep.subr.bf16.mxu1 %v3895_v27  ;;  %v3973_v24 = vld [vmem:[%s6037_s4 + $0x70] ss:$24 sps:$4 sm:$0xff]   ;;  %v3979_v27 = vld [vmem:[%s6037_s4 + $0xa0] ss:$24 sps:$4 sm:$0xff]  }
  0x7b   :  { %1965 = vmatprep.subr.bf16.mxu0 %v3892_v26  ;;  %v3976_v26 = vld [vmem:[%s6037_s4 + $0x398] ss:$24 sps:$4 sm:$0xff]  }
  0x7d   :  { %2007 = vmatpush1.bf16.msra.mxu1 %v3893_v29  ;;  %v3987_v29 = vld [vmem:[%s6037_s4 + $0xd4] ss:$24 sps:$4 sm:$0xff]  }
  0x7e   :  { %1966 = vmatpush1.bf16.msra.mxu0 %v3890_v28  ;;  %2008 = vmatprep.subr.bf16.mxu1 %v3901_v31  ;;  %v3984_v28 = vld [vmem:[%s6037_s4 + $0x3cc] ss:$24 sps:$4 sm:$0xff]   ;;  %v3985_v31 = vld [vmem:[%s6037_s4 + $0xd0] ss:$24 sps:$4 sm:$0xff]  }
  0x7f   :  { %1967 = vmatprep.subr.bf16.mxu0 %v3898_v30  ;;  %v3982_v30 = vld [vmem:[%s6037_s4 + $0x3c8] ss:$24 sps:$4 sm:$0xff]  }
  0x81   :  { %2009 = vmatpush1.bf16.msra.mxu1 %v3899_v35  ;;  %v3988_v35 = vld [vmem:[%s6037_s4 + $0x3f8] ss:$24 sps:$4 sm:$0xff]  }
  0x82   :  { %1968 = vmatpush1.bf16.msra.mxu0 %v3896_v33  ;;  %2010 = vmatprep.subr.bf16.mxu1 %v3907_v37  ;;  %v3993_v33 = vld [vmem:[%s6037_s4 + $0x104] ss:$24 sps:$4 sm:$0xff]  }
  0x83   :  { %1969 = vmatprep.subr.bf16.mxu0 %v3904_v36  ;;  %v3991_v36 = vld [vmem:[%s6037_s4 + $0x100] ss:$24 sps:$4 sm:$0xff]   ;;  %v3996_v37 = vld [vmem:[%s6037_s4 + $0x42c] ss:$24 sps:$4 sm:$0xff]  }
  0x85   :  { %2011 = vmatpush1.bf16.msra.mxu1 %v3905_v39  ;;  %v3994_v39 = vld [vmem:[%s6037_s4 + $0x428] ss:$24 sps:$4 sm:$0xff]  }
  0x86   :  { %1970 = vmatpush1.bf16.msra.mxu0 %v3902_v38  ;;  %2012 = vmatprep.subr.bf16.mxu1 %v3913_v41  ;;  %v3999_v38 = vld [vmem:[%s6037_s4 + $0x134] ss:$24 sps:$4 sm:$0xff]  }
  0x87   :  { %1971 = vmatprep.subr.bf16.mxu0 %v3910_v40  ;;  %v3997_v40 = vld [vmem:[%s6037_s4 + $0x130] ss:$24 sps:$4 sm:$0xff]   ;;  %v4002_v41 = vld [vmem:[%s6037_s4 + $0x45c] ss:$24 sps:$4 sm:$0xff]  }
  0x89   :  { %2013 = vmatpush1.bf16.msra.mxu1 %v3911_v43  ;;  %v4000_v43 = vld [vmem:[%s6037_s4 + $0x458] ss:$24 sps:$4 sm:$0xff]  }
  0x8a   :  { %1972 = vmatpush1.bf16.msra.mxu0 %v3908_v42  ;;  %2014 = vmatprep.subr.bf16.mxu1 %v3919_v45  ;;  %v4005_v42 = vld [vmem:[%s6037_s4 + $0x164] ss:$24 sps:$4 sm:$0xff]  }
  0x8b   :  { %1973 = vmatprep.subr.bf16.mxu0 %v3916_v44  ;;  %v4003_v44 = vld [vmem:[%s6037_s4 + $0x160] ss:$24 sps:$4 sm:$0xff]   ;;  %v4008_v45 = vld [vmem:[%s6037_s4 + $0x48c] ss:$24 sps:$4 sm:$0xff]  }
  0x8d   :  { %2015 = vmatpush1.bf16.msra.mxu1 %v3917_v48  ;;  %v4006_v48 = vld [vmem:[%s6037_s4 + $0x488] ss:$24 sps:$4 sm:$0xff]  }
  0x8e   :  { %1974 = vmatpush1.bf16.msra.mxu0 %v3914_v46  ;;  %2016 = vmatprep.subr.bf16.mxu1 %v3925_v50  ;;  %v4011_v46 = vld [vmem:[%s6037_s4 + $0x194] ss:$24 sps:$4 sm:$0xff]  }
  0x8f   :  { %1975 = vmatprep.subr.bf16.mxu0 %v3922_v49  ;;  %v4009_v49 = vld [vmem:[%s6037_s4 + $0x190] ss:$24 sps:$4 sm:$0xff]   ;;  %v4014_v50 = vld [vmem:[%s6037_s4 + $0x4bc] ss:$24 sps:$4 sm:$0xff]  }
  0x91   :  { %2017 = vmatpush1.bf16.msra.mxu1 %v3923_v53  ;;  %v4012_v53 = vld [vmem:[%s6037_s4 + $0x4b8] ss:$24 sps:$4 sm:$0xff]  }
  0x92   :  { %1976 = vmatpush1.bf16.msra.mxu0 %v3920_v52  ;;  %2018 = vmatprep.subr.bf16.mxu1 %v3931_v55  ;;  %v4017_v52 = vld [vmem:[%s6037_s4 + $0x1c4] ss:$24 sps:$4 sm:$0xff]  }
  0x93   :  { %1977 = vmatprep.subr.bf16.mxu0 %v3928_v54  ;;  %v4015_v54 = vld [vmem:[%s6037_s4 + $0x1c0] ss:$24 sps:$4 sm:$0xff]   ;;  %v4020_v55 = vld [vmem:[%s6037_s4 + $0x4ec] ss:$24 sps:$4 sm:$0xff]  }
  0x95   :  { %2019 = vmatpush1.bf16.msra.mxu1 %v3929_v57  ;;  %v4018_v57 = vld [vmem:[%s6037_s4 + $0x4e8] ss:$24 sps:$4 sm:$0xff]  }
  0x96   :  { %1978 = vmatpush1.bf16.msra.mxu0 %v3926_v56  ;;  %2020 = vmatprep.subr.bf16.mxu1 %v3937_v59  ;;  %v4023_v56 = vld [vmem:[%s6037_s4 + $0x1f4] ss:$24 sps:$4 sm:$0xff]  }
  0x97   :  { %1979 = vmatprep.subr.bf16.mxu0 %v3934_v58  ;;  %v4021_v58 = vld [vmem:[%s6037_s4 + $0x1f0] ss:$24 sps:$4 sm:$0xff]   ;;  %v4026_v59 = vld [vmem:[%s6037_s4 + $0x51c] ss:$24 sps:$4 sm:$0xff]  }
  0x99   :  { %2021 = vmatpush1.bf16.msra.mxu1 %v3935_v61  ;;  %v4024_v61 = vld [vmem:[%s6037_s4 + $0x518] ss:$24 sps:$4 sm:$0xff]  }
  0x9a   :  { %1980 = vmatpush1.bf16.msra.mxu0 %v3932_v60  ;;  %2022 = vmatprep.subr.bf16.mxu1 %v3943_v63  ;;  %v4029_v60 = vld [vmem:[%s6037_s4 + $0x224] ss:$24 sps:$4 sm:$0xff]  }
  0x9b   :  { %1981 = vmatprep.subr.bf16.mxu0 %v3940_v62  ;;  %v4027_v62 = vld [vmem:[%s6037_s4 + $0x220] ss:$24 sps:$4 sm:$0xff]   ;;  %v4032_v63 = vld [vmem:[%s6037_s4 + $0x54c] ss:$24 sps:$4 sm:$0xff]  }
  0x9d   :  { %2023 = vmatpush1.bf16.msra.mxu1 %v3941_v1  ;;  %v4030_v1 = vld [vmem:[%s6037_s4 + $0x548] ss:$24 sps:$4 sm:$0xff]  }
  0x9e   :  { %1982 = vmatpush1.bf16.msra.mxu0 %v3938_v0  ;;  %2024 = vmatprep.subr.bf16.mxu1 %v3949_v3  ;;  %v4035_v0 = vld [vmem:[%s6037_s4 + $0x254] ss:$24 sps:$4 sm:$0xff]  }
  0x9f   :  { %1983 = vmatprep.subr.bf16.mxu0 %v3946_v2  ;;  %v4033_v2 = vld [vmem:[%s6037_s4 + $0x250] ss:$24 sps:$4 sm:$0xff]   ;;  %v4038_v3 = vld [vmem:[%s6037_s4 + $0x57c] ss:$24 sps:$4 sm:$0xff]  }
  0xa1   :  { %2025 = vmatpush1.bf16.msra.mxu1 %v3947_v5  ;;  %v4036_v5 = vld [vmem:[%s6037_s4 + $0x578] ss:$24 sps:$4 sm:$0xff]  }
  0xa2   :  { %1984 = vmatpush1.bf16.msra.mxu0 %v3944_v4  ;;  %2026 = vmatprep.subr.bf16.mxu1 %v3955_v9  ;;  %v4041_v4 = vld [vmem:[%s6037_s4 + $0x284] ss:$24 sps:$4 sm:$0xff]   ;;  %v382_v9 = vlaneseq }
  0xa3   :  { %1985 = vmatprep.subr.bf16.mxu0 %v3952_v8  ;;  %v4039_v8 = vld [vmem:[%s6037_s4 + $0x280] ss:$24 sps:$4 sm:$0xff]  }
  0xa5   :  { %2027 = vmatpush1.bf16.msra.mxu1 %v3953_v11  ;;  %v4047_v11 = vld [vmem:[%s6037_s4 + $0x2b4] ss:$24 sps:$4 sm:$0xff]  }
  0xa6   :  { %1986 = vmatpush1.bf16.msra.mxu0 %v3950_v10  ;;  %2037 = vmatprep.subr.bf16.mxu1 %v3960_v12  ;;  %v4044_v10 = vld [vmem:[%s6037_s4 + $0x5ac] ss:$24 sps:$4 sm:$0xff]   ;;  %v4042_v12 = vld [vmem:[%s6037_s4 + $0x5a8] ss:$24 sps:$4 sm:$0xff]  }
  0xa7   :  { %2119 = vmatprep.subr.bf16.mxu0 %v3963_v13  ;;  %v4045_v13 = vld [vmem:[%s6037_s4 + $0x2b0] ss:$24 sps:$4 sm:$0xff]  }
  0xa8   :  { %2029 = vmatmul.mubr.bf16.vlgmr.msra.gmra.mrb[4].mxu1 %v4550_v6 }
  0xa9   :  { %1988 = vmatmul.mubr.bf16.vlgmr.msra.gmra.mrb[0].mxu0 %v4761_v14  ;;  %2038 = vmatpush1.bf16.msra.mxu1 %v3958_v15  ;;  %v2803_v15 = vstv %s4914_s18 }
  0xaa   :  { %2120 = vmatpush1.bf16.msra.mxu0 %v3961_v16  ;;  %2039 = vmatprep.subr.bf16.mxu1 %v3966_v17  ;;  %v2807_v16 = vstv %s4916_s19  ;;  %v2818_v17 = vstv %s4921_s22  ;;  %s2399_s22 = scalar_lea.vmem %s6039_s6, %s5191_s26  ;;  %s2368_s19 = scalar_lea.vmem %s6039_s6, %s5207_s0 }
  0xab   :  { %2121 = vmatprep.subr.bf16.mxu0 %v3969_v18  ;;  %2069 = vmatprep.mubr.bf16.mxu1 %v4492_v51  ;;  %v4050_v18 = vld [vmem:[%s6037_s4 + $0x5dc] ss:$24 sps:$4 sm:$0xff]   ;;  %s5306_s0 = sld [smem:[#allocation2 + $0x85]] }
  0xac   :  { %2151 = vmatprep.mubr.bf16.mxu0 %v4481_v47  ;;  %v3981_v47 = vld [vmem:[%s6037_s4 + $0xa4] ss:$24 sps:$4 sm:$0xff]  }
  0xad   :  { %2040 = vmatpush1.bf16.msra.mxu1 %v3964_v19  ;;  %v4959_v19 = vshrl.u32 %v382_v9, 7 }
  0xae   :  { %2122 = vmatpush1.bf16.msra.mxu0 %v3967_v20  ;;  %2041 = vmatprep.subr.bf16.mxu1 %v3972_v21  ;;  %v2822_v20 = vstv %s4923_s2  ;;  %v2833_v21 = vstv %s4928_s3 }
  0xaf   :  { %2123 = vmatprep.subr.bf16.mxu0 %v3975_v22  ;;  %v2837_v22 = vstv %s4930_s25 }
  0xb1   :  { %2042 = vmatpush1.bf16.msra.mxu1 %v3970_v23  ;;  %v4053_v23 = vld [vmem:[%s6037_s4 + $0x2e4] ss:$24 sps:$4 sm:$0xff]  }
  0xb2   :  { %2124 = vmatpush1.bf16.msra.mxu0 %v3973_v24  ;;  %2043 = vmatprep.subr.bf16.mxu1 %v3978_v25  ;;  %v2800_v24 = vld [vmem:[%s6047_s14] sm:$0x1] }
  0xb3   :  { %2125 = vmatprep.subr.bf16.mxu0 %v3981_v47  ;;  %v2801_v25 = vld [vmem:[%s6048_s15] sm:$0x1]  ;;  %v4048_v47 = vld [vmem:[%s6037_s4 + $0x5d8] ss:$24 sps:$4 sm:$0xff]  }
  0xb5   :  { %2044 = vmatpush1.bf16.msra.mxu1 %v3976_v26  ;;  %v2804_v26 = vmul.f32 %v2803_v15, %v2800_v24  ;;  %v4071_v15 = vld [vmem:[%s6037_s4 + $0x374] ss:$24 sps:$4 sm:$0xff]  }
  0xb6   :  { %2126 = vmatpush1.bf16.msra.mxu0 %v3979_v27  ;;  %2045 = vmatprep.subr.bf16.mxu1 %v3984_v28  ;;  %v2808_v27 = vmul.f32 %v2807_v16, %v2800_v24  ;;  %v2819_v28 = vmul.f32 %v2818_v17, %v2800_v24 }
  0xb7   :  { %2127 = vmatprep.subr.bf16.mxu0 %v3987_v29  ;;  %v3626_v29 = vld [vmem:[%s6042_s9] ss:$0 sm:$0xff]  ;;  %s5189_s9 = sld [smem:[#allocation2 + $0x80]] }
  0xb9   :  { %2046 = vmatpush1.bf16.msra.mxu1 %v3982_v30  ;;  %v3144_v30 = vsub.s32 6, %v4959_v19 }
  0xba   :  { %2128 = vmatpush1.bf16.msra.mxu0 %v3985_v31  ;;  %2047 = vmatprep.subr.bf16.mxu1 %v3990_v32  ;;  %v2823_v31 = vmul.f32 %v2822_v20, %v2800_v24  ;;  %v2834_v32 = vmul.f32 %v2833_v21, %v2800_v24  ;;  %v4066_v20 = vld [vmem:[%s6037_s4 + $0x668] ss:$24 sps:$4 sm:$0xff]   ;;  %v4074_v21 = vld [vmem:[%s6037_s4 + $0x69c] ss:$24 sps:$4 sm:$0xff]  }
  0xbb   :  { %2129 = vmatprep.subr.bf16.mxu0 %v3993_v33  ;;  %v2838_v33 = vmul.f32 %v2837_v22, %v2800_v24  ;;  %v4077_v22 = vld [vmem:[%s6037_s4 + $0x3a4] ss:$24 sps:$4 sm:$0xff]   ;;  %v4075_v24 = vld [vmem:[%s6037_s4 + $0x3a0] ss:$24 sps:$4 sm:$0xff]  }
  0xbd   :  { %2048 = vmatpush1.bf16.msra.mxu1 %v3988_v35  ;;  %v3067_v35 = vld [vmem:[%s6043_s10] sm:$0x1]  ;;  %s2396_s10 = scalar_lea.vmem %s6039_s6, %s5189_s9  ;;  %s5244_s9 = sld [smem:[#allocation2 + $0x3]] }
  0xbe   :  { %2130 = vmatpush1.bf16.msra.mxu0 %v3991_v36  ;;  %2049 = vmatprep.subr.bf16.mxu1 %v3996_v37  ;;  %v3116_v36 = vld [vmem:[%s6046_s13] sm:$0xff] }
  0xbf   :  { %2131 = vmatprep.subr.bf16.mxu0 %v3999_v38  ;;  %v4051_v37 = vld [vmem:[%s6037_s4 + $0x2e0] ss:$24 sps:$4 sm:$0xff]   ;;  %v4056_v38 = vld [vmem:[%s6037_s4 + $0x60c] ss:$24 sps:$4 sm:$0xff]  }
  0xc1   :  { %2050 = vmatpush1.bf16.msra.mxu1 %v3994_v39  ;;  %v4993_v39 = vsub.s32 0, %v4959_v19 }
  0xc2   :  { %2132 = vmatpush1.bf16.msra.mxu0 %v3997_v40  ;;  %2051 = vmatprep.subr.bf16.mxu1 %v4002_v41  ;;  %v2805_v40 = vadd.f32 %v2804_v26, %v2801_v25  ;;  %v2809_v41 = vadd.f32 %v2808_v27, %v2801_v25  ;;  %v4078_v26 = vld [vmem:[%s6037_s4 + $0x6c8] ss:$24 sps:$4 sm:$0xff]  }
  0xc3   :  { %2133 = vmatprep.subr.bf16.mxu0 %v4005_v42  ;;  %v4059_v42 = vld [vmem:[%s6037_s4 + $0x314] ss:$24 sps:$4 sm:$0xff]   ;;  %v4081_v27 = vld [vmem:[%s6037_s4 + $0x3d0] ss:$24 sps:$4 sm:$0xff]   ;;  %s2376_s18 = scalar_lea.vmem %s6039_s6, %s5244_s9  ;;  %s5342_s9 = sld [smem:[#allocation2 + $0x6]] }
  0xc5   :  { %2052 = vmatpush1.bf16.msra.mxu1 %v4000_v43  ;;  %v2820_v43 = vadd.f32 %v2819_v28, %v2801_v25  ;;  %v4086_v28 = vld [vmem:[%s6037_s4 + $0x6fc] ss:$24 sps:$4 sm:$0xff]  }
  0xc6   :  { %2134 = vmatpush1.bf16.msra.mxu0 %v4003_v44  ;;  %2053 = vmatprep.subr.bf16.mxu1 %v4008_v45  ;;  %v2824_v44 = vadd.f32 %v2823_v31, %v2801_v25  ;;  %v2835_v45 = vadd.f32 %v2834_v32, %v2801_v25  ;;  %v4087_v31 = vld [vmem:[%s6037_s4 + $0x400] ss:$24 sps:$4 sm:$0xff]   ;;  %v4092_v32 = vld [vmem:[%s6037_s4 + $0x72c] ss:$24 sps:$4 sm:$0xff]  }
  0xc7   :  { %2135 = vmatprep.subr.bf16.mxu0 %v4011_v46  ;;  %v2904_v46 = vld [vmem:[%s6045_s12] sm:$0x1]  ;;  %s5209_s12 = sld [smem:[#allocation2 + $0x82]] }
  0xc9   :  { %2054 = vmatpush1.bf16.msra.mxu1 %v4006_v48  ;;  %v3154_v48 = vrot.slane %v3626_v29, 7  ;;  %v4089_v29 = vld [vmem:[%s6037_s4 + $0x404] ss:$24 sps:$4 sm:$0xff]   ;;  %s2388_s20 = scalar_lea.vmem %s6039_s6, %s5342_s9 }
  0xca   :  { %2136 = vmatpush1.bf16.msra.mxu0 %v4009_v49  ;;  %2055 = vmatprep.subr.bf16.mxu1 %v4014_v50  ;;  %v2814_v49 = vrot.slane %v2809_v41, %v4993_v39  ;;  %v2839_v50 = vadd.f32 %v2838_v33, %v2801_v25  ;;  %v4080_v25 = vld [vmem:[%s6037_s4 + $0x6cc] ss:$24 sps:$4 sm:$0xff]   ;;  %v4099_v41 = vld [vmem:[%s6037_s4 + $0x460] ss:$24 sps:$4 sm:$0xff]  }
  0xcb   :  { %2137 = vmatprep.subr.bf16.mxu0 %v4017_v52  ;;  %v2903_v52 = vld [vmem:[%s6044_s11] sm:$0x1]  ;;  %v4095_v33 = vld [vmem:[%s6037_s4 + $0x434] ss:$24 sps:$4 sm:$0xff]   ;;  %s2372_s11 = scalar_lea.vmem %s6039_s6, %s5223_s21  ;;  %s5310_s21 = sld [smem:[#allocation2 + $0x5]] }
  0xcd   :  { %2056 = vmatpush1.bf16.msra.mxu1 %v4012_v53  ;;  %v3145_v53 = vrot.slane %v3116_v36, %v3144_v30  ;;  %v4084_v30 = vld [vmem:[%s6037_s4 + $0x6f8] ss:$24 sps:$4 sm:$0xff]   ;;  %s2403_s26 = scalar_lea.vmem %s6039_s6, %s5209_s12 }
  0xce   :  { %2138 = vmatpush1.bf16.msra.mxu0 %v4015_v54  ;;  %2057 = vmatprep.subr.bf16.mxu1 %v4020_v55  ;;  %v3186_v54 = vrot.slane %v3067_v35, 5  ;;  %v4054_v55 = vld [vmem:[%s6037_s4 + $0x608] ss:$24 sps:$4 sm:$0xff]  }
  0xcf   :  { %2139 = vmatprep.subr.bf16.mxu0 %v4023_v56  ;;  %v4057_v56 = vld [vmem:[%s6037_s4 + $0x310] ss:$24 sps:$4 sm:$0xff]  }
  0xd0   :  { %v4090_v35 = vld [vmem:[%s6037_s4 + $0x728] ss:$24 sps:$4 sm:$0xff]  }
  0xd1   :  { %2058 = vmatpush1.bf16.msra.mxu1 %v4018_v57  ;;  %v2829_v57 = vrot.slane %v2824_v44, %v4993_v39  ;;  %v4093_v36 = vld [vmem:[%s6037_s4 + $0x430] ss:$24 sps:$4 sm:$0xff]   ;;  %s2384_s14 = scalar_lea.vmem %s6039_s6, %s5310_s21 }
  0xd2   :  { %2140 = vmatpush1.bf16.msra.mxu0 %v4021_v58  ;;  %2059 = vmatprep.subr.bf16.mxu1 %v4026_v59  ;;  %v4062_v58 = vld [vmem:[%s6037_s4 + $0x63c] ss:$24 sps:$4 sm:$0xff]   ;;  %v2816_v59 = vsel %vm2429_vm0, %v2805_v40, %v2814_v49  ;;  %v4096_v40 = vld [vmem:[%s6037_s4 + $0x758] ss:$24 sps:$4 sm:$0xff]   ;;  %v4102_v44 = vld [vmem:[%s6037_s4 + $0x788] ss:$24 sps:$4 sm:$0xff]  }
  0xd3   :  { %2141 = vmatprep.subr.bf16.mxu0 %v4029_v60  ;;  %v3187_v60 = vrot.slane %v2904_v46, 5  ;;  %v4108_v49 = vld [vmem:[%s6037_s4 + $0x7b8] ss:$24 sps:$4 sm:$0xff]  }
  0xd5   :  { %2060 = vmatpush1.bf16.msra.mxu1 %v4024_v61  ;;  %v3216_v61 = vrot.slane %v3145_v53, 4  ;;  %v4119_v53 = vld [vmem:[%s6037_s4 + $0x4f4] ss:$24 sps:$4 sm:$0xff]  }
  0xd6   :  { %2142 = vmatpush1.bf16.msra.mxu0 %v4027_v62  ;;  %2061 = vmatprep.subr.bf16.mxu1 %v4032_v63  ;;  %v4065_v62 = vld [vmem:[%s6037_s4 + $0x344] ss:$24 sps:$4 sm:$0xff]   ;;  %v3217_v63 = vrot.slane %v2835_v45, 4  ;;  %v4105_v45 = vld [vmem:[%s6037_s4 + $0x490] ss:$24 sps:$4 sm:$0xff]  }
  0xd7   :  { %2143 = vmatprep.subr.bf16.mxu0 %v4035_v0  ;;  %v2831_v0 = vsel %vm2429_vm0, %v2820_v43, %v2829_v57  ;;  %v4107_v43 = vld [vmem:[%s6037_s4 + $0x494] ss:$24 sps:$4 sm:$0xff]   ;;  %v4125_v57 = vld [vmem:[%s6037_s4 + $0x524] ss:$24 sps:$4 sm:$0xff]  }
  0xd9   :  { %2062 = vmatpush1.bf16.msra.mxu1 %v4030_v1  ;;  %v3155_v1 = vrot.slane %v2816_v59, 7  ;;  %v4123_v59 = vld [vmem:[%s6037_s4 + $0x520] ss:$24 sps:$4 sm:$0xff]  }
  0xda   :  { %2144 = vmatpush1.bf16.msra.mxu0 %v4033_v2  ;;  %2063 = vmatprep.subr.bf16.mxu1 %v4038_v3  ;;  %v3234_v2 = vsel %vm2429_vm0, %v2903_v52, %v3154_v48  ;;  %v3218_v3 = vrot.slane %v2839_v50, 4  ;;  %v4113_v48 = vld [vmem:[%s6037_s4 + $0x4c4] ss:$24 sps:$4 sm:$0xff]   ;;  %v4111_v50 = vld [vmem:[%s6037_s4 + $0x4c0] ss:$24 sps:$4 sm:$0xff]  }
  0xdb   :  { %2145 = vmatprep.subr.bf16.mxu0 %v4041_v4  ;;  %v3162_v4 = vrot.slane %v2831_v0, 7  ;;  %v3235_v9 = vsel %vm2429_vm0, %v2904_v46, %v3155_v1  ;;  %v4116_v52 = vld [vmem:[%s6037_s4 + $0x7ec] ss:$24 sps:$4 sm:$0xff]   ;;  %v4134_v0 = vld [vmem:[%s6037_s4 + $0x87c] ss:$24 sps:$4 sm:$0xff]  }
  0xdc   :  { %v4137_v1 = vld [vmem:[%s6037_s4 + $0x584] ss:$24 sps:$4 sm:$0xff]  }
  0xdd   :  { %2064 = vmatpush1.bf16.msra.mxu1 %v4036_v5  ;;  %v3250_v5 = vsel %vm3243_vm1, %v3234_v2, %v3186_v54  ;;  %v4114_v54 = vld [vmem:[%s6037_s4 + $0x7e8] ss:$24 sps:$4 sm:$0xff]   ;;  %v4132_v2 = vld [vmem:[%s6037_s4 + $0x878] ss:$24 sps:$4 sm:$0xff]  }
  0xde   :  { %2146 = vmatpush1.bf16.msra.mxu0 %v4039_v8  ;;  %2065 = vmatprep.subr.bf16.mxu1 %v4044_v10  ;;  %v4060_v8 = vld [vmem:[%s6037_s4 + $0x638] ss:$24 sps:$4 sm:$0xff]   ;;  %v3266_v10 = vsel %vm3259_vm2, %v3250_v5, %v3216_v61  ;;  %v4131_v61 = vld [vmem:[%s6037_s4 + $0x554] ss:$24 sps:$4 sm:$0xff]  }
  0xdf   :  { %2147 = vmatprep.subr.bf16.mxu0 %v4047_v11  ;;  %v4063_v11 = vld [vmem:[%s6037_s4 + $0x340] ss:$24 sps:$4 sm:$0xff]   ;;  %3281 = vst [vmem:[%s6049_s16 + $0x30] sm:$0x1f] %v3266_v10  ;;  %3289 = vst [vmem:[%s6049_s16 + $0x70] sm:$0x1f] %v3266_v10 }
  0xe0   :  { %v4143_v5 = vld [vmem:[%s6037_s4 + $0x5b4] ss:$24 sps:$4 sm:$0xff]  }
  0xe1   :  { %2066 = vmatpush1.bf16.msra.mxu1 %v4042_v12  ;;  %v3242_v12 = vsel %vm2429_vm0, %v2904_v46, %v3162_v4  ;;  %v4110_v46 = vld [vmem:[%s6037_s4 + $0x7bc] ss:$24 sps:$4 sm:$0xff]   ;;  %v4140_v4 = vld [vmem:[%s6037_s4 + $0x8ac] ss:$24 sps:$4 sm:$0xff]  }
  0xe2   :  { %2148 = vmatpush1.bf16.msra.mxu0 %v4045_v13  ;;  %2067 = vmatprep.subr.bf16.mxu1 %v4050_v18  ;;  %v3251_v13 = vsel %vm3243_vm1, %v3235_v9, %v3187_v60  ;;  %v3258_v16 = vsel %vm3243_vm1, %v3242_v12, %v3187_v60  ;;  %v4128_v60 = vld [vmem:[%s6037_s4 + $0x84c] ss:$24 sps:$4 sm:$0xff]   ;;  %v4141_v9 = vld [vmem:[%s6037_s4 + $0x5b0] ss:$24 sps:$4 sm:$0xff]   ;;  %v4146_v10 = vld [vmem:[%s6037_s4 + $0x8dc] ss:$24 sps:$4 sm:$0xff]  }
  0xe3   :  { %2149 = vmatprep.subr.bf16.mxu0 %v4053_v23  ;;  %v3267_v17 = vsel %vm3259_vm2, %v3251_v13, %v3217_v63  ;;  %v3274_v18 = vsel %vm3259_vm2, %v3258_v16, %v3218_v3  ;;  %v4072_v23 = vld [vmem:[%s6037_s4 + $0x698] ss:$24 sps:$4 sm:$0xff]   ;;  %v2432_v12 = vld [vmem:[%s6040_s7 + $0x8] sm:$0xff] }
  0xe4   :  { %3282 = vst [vmem:[%s6049_s16 + $0x38] sm:$0x1f] %v3267_v17  ;;  %3290 = vst [vmem:[%s6049_s16 + $0x78] sm:$0x1f] %v3274_v18  ;;  %v4129_v63 = vld [vmem:[%s6037_s4 + $0x550] ss:$24 sps:$4 sm:$0xff]  }
  0xe5   :  { %2068 = vmatpush1.bf16.msra.mxu1 %v4048_v47  ;;  %v4083_v47 = vld [vmem:[%s6037_s4 + $0x3d4] ss:$24 sps:$4 sm:$0xff]   ;;  %v4135_v3 = vld [vmem:[%s6037_s4 + $0x580] ss:$24 sps:$4 sm:$0xff]  }
  0xe6   :  { %2150 = vmatpush1.bf16.msra.mxu0 %v4051_v37  ;;  %2078 = vmatprep.subr.bf16.mxu1 %v4056_v38  ;;  %v4098_v37 = vld [vmem:[%s6037_s4 + $0x75c] ss:$24 sps:$4 sm:$0xff]   ;;  %v2431_v17 = vld [vmem:[%s6040_s7] sm:$0xff] }
  0xe7   :  { %2160 = vmatprep.subr.bf16.mxu0 %v4059_v42  ;;  %v4101_v38 = vld [vmem:[%s6037_s4 + $0x464] ss:$24 sps:$4 sm:$0xff]   ;;  %v4152_v16 = vld [vmem:[%s6037_s4 + $0x614] ss:$24 sps:$4 sm:$0xff]  }
  0xe8   :  { %2070 = vmatmul.mubr.bf16.vlgmr.msra.gmra.mrb[4].mxu1 %v4552_v7  ;;  %v4104_v42 = vld [vmem:[%s6037_s4 + $0x78c] ss:$24 sps:$4 sm:$0xff]   ;;  %v2438_v13 = vld [vmem:[%s6040_s7 + $0x38] sm:$0xff] }
  0xe9   :  { %2152 = vmatmul.mubr.bf16.vlgmr.msra.gmra.mrb[4].mxu0 %v4550_v6  ;;  %2079 = vmatpush1.bf16.msra.mxu1 %v4054_v55  ;;  %v4068_v6 = vld [vmem:[%s6037_s4 + $0x66c] ss:$24 sps:$4 sm:$0xff]   ;;  %v4117_v55 = vld [vmem:[%s6037_s4 + $0x4f0] ss:$24 sps:$4 sm:$0xff]   ;;  %v3631_v18 = vpack.c.bf16 %v2438_v13, %v2432_v12 }
  0xea   :  { %2161 = vmatpush1.bf16.msra.mxu0 %v4057_v56  ;;  %2080 = vmatprep.subr.bf16.mxu1 %v4062_v58  ;;  %v4122_v56 = vld [vmem:[%s6037_s4 + $0x81c] ss:$24 sps:$4 sm:$0xff]   ;;  %v4120_v58 = vld [vmem:[%s6037_s4 + $0x818] ss:$24 sps:$4 sm:$0xff]  }
  0xeb   :  { %2162 = vmatprep.subr.bf16.mxu0 %v4065_v62  ;;  %2110 = vmatprep.mubr.bf16.mxu1 %v4639_v34  ;;  %v4126_v62 = vld [vmem:[%s6037_s4 + $0x848] ss:$24 sps:$4 sm:$0xff]  }
  0xec   :  { %2192 = vmatprep.mubr.bf16.mxu0 %v4492_v51  ;;  %v4069_v51 = vld [vmem:[%s6037_s4 + $0x370] ss:$24 sps:$4 sm:$0xff]  }
  0xed   :  { %2081 = vmatpush1.bf16.msra.mxu1 %v4060_v8  ;;  %v4138_v8 = vld [vmem:[%s6037_s4 + $0x8a8] ss:$24 sps:$4 sm:$0xff]  }
  0xee   :  { %2163 = vmatpush1.bf16.msra.mxu0 %v4063_v11  ;;  %2082 = vmatprep.subr.bf16.mxu1 %v4068_v6  ;;  %v4149_v11 = vld [vmem:[%s6037_s4 + $0x5e4] ss:$24 sps:$4 sm:$0xff]   ;;  %v4144_v6 = vld [vmem:[%s6037_s4 + $0x8d8] ss:$24 sps:$4 sm:$0xff]  }
  0xef   :  { %2164 = vmatprep.subr.bf16.mxu0 %v4071_v15  ;;  %v4147_v15 = vld [vmem:[%s6037_s4 + $0x5e0] ss:$24 sps:$4 sm:$0xff]   ;;  %v4162_v12 = vld [vmem:[%s6037_s4 + $0x6d0] ss:$24 sps:$4 sm:$0xff]  }
  0xf1   :  { %2083 = vmatpush1.bf16.msra.mxu1 %v4066_v20  ;;  %v2437_v20 = vld [vmem:[%s6040_s7 + $0x30] sm:$0xff] }
  0xf2   :  { %2165 = vmatpush1.bf16.msra.mxu0 %v4069_v51  ;;  %2084 = vmatprep.subr.bf16.mxu1 %v4074_v21  ;;  %v2397_v51 = vld [vmem:[%s2396_s10] sm:$0x1] }
  0xf3   :  { %2166 = vmatprep.subr.bf16.mxu0 %v4077_v22  ;;  %v2400_v21 = vld [vmem:[%s2399_s22] sm:$0x1]  ;;  %v2444_v22 = vld [vmem:[%s6040_s7 + $0x68] sm:$0xff] }
  0xf5   :  { %2085 = vmatpush1.bf16.msra.mxu1 %v4072_v23  ;;  %v2450_v23 = vld [vmem:[%s6040_s7 + $0x98] sm:$0xff] }
  0xf6   :  { %2167 = vmatpush1.bf16.msra.mxu0 %v4075_v24  ;;  %2086 = vmatprep.subr.bf16.mxu1 %v4080_v25  ;;  %v4150_v24 = vld [vmem:[%s6037_s4 + $0x610] ss:$24 sps:$4 sm:$0xff]   ;;  %v3633_v25 = vpack.c.bf16 %v2437_v20, %v2431_v17 }
  0xf7   :  { %2168 = vmatprep.subr.bf16.mxu0 %v4083_v47  ;;  %v4155_v47 = vld [vmem:[%s6037_s4 + $0x644] ss:$24 sps:$4 sm:$0xff]   ;;  %v2497_v20 = vld [vmem:[%s6040_s7 + $0x210] sm:$0xff] }
  0xf9   :  { %2087 = vmatpush1.bf16.msra.mxu1 %v4078_v26  ;;  %v2443_v26 = vld [vmem:[%s6040_s7 + $0x60] sm:$0xff] }
  0xfa   :  { %2169 = vmatpush1.bf16.msra.mxu0 %v4081_v27  ;;  %2088 = vmatprep.subr.bf16.mxu1 %v4086_v28  ;;  %v2449_v27 = vld [vmem:[%s6040_s7 + $0x90] sm:$0xff]  ;;  %v2401_v28 = vadd.f32 %v2400_v21, %v2397_v51  ;;  %v2385_v51 = vld [vmem:[%s2384_s14] sm:$0x1] }
  0xfb   :  { %2170 = vmatprep.subr.bf16.mxu0 %v4089_v29  ;;  %v3635_v29 = vpack.c.bf16 %v2450_v23, %v2444_v22  ;;  %v2504_v22 = vld [vmem:[%s6040_s7 + $0x248] sm:$0xff]  ;;  %v2510_v23 = vld [vmem:[%s6040_s7 + $0x278] sm:$0xff] }
  0xfd   :  { %2089 = vmatpush1.bf16.msra.mxu1 %v4084_v30  ;;  %v2366_v30 = vld [vmem:[%s2365_s29] sm:$0x1]  ;;  %s5339_s29 = sld [smem:[#allocation2 + $0x86]] }
  0xfe   :  { %2171 = vmatpush1.bf16.msra.mxu0 %v4087_v31  ;;  %2090 = vmatprep.subr.bf16.mxu1 %v4092_v32  ;;  %v2369_v31 = vld [vmem:[%s2368_s19] sm:$0x1]  ;;  %s5370_s19 = sld [smem:[#allocation2 + $0x87]] }
  0xff   :  { %2172 = vmatprep.subr.bf16.mxu0 %v4095_v33  ;;  %v2404_v32 = vld [vmem:[%s2403_s26] sm:$0x1]  ;;  %v2456_v33 = vld [vmem:[%s6040_s7 + $0xc8] sm:$0xff] }
 0x101   :  { %2091 = vmatpush1.bf16.msra.mxu1 %v4090_v35  ;;  %v2462_v35 = vld [vmem:[%s6040_s7 + $0xf8] sm:$0xff] }
 0x102   :  { %2173 = vmatpush1.bf16.msra.mxu0 %v4093_v36  ;;  %2092 = vmatprep.subr.bf16.mxu1 %v4098_v37  ;;  %v4153_v36 = vld [vmem:[%s6037_s4 + $0x640] ss:$24 sps:$4 sm:$0xff]   ;;  %v3637_v37 = vpack.c.bf16 %v2449_v27, %v2443_v26 }
 0x103   :  { %2174 = vmatprep.subr.bf16.mxu0 %v4101_v38  ;;  %v4158_v38 = vld [vmem:[%s6037_s4 + $0x674] ss:$24 sps:$4 sm:$0xff]   ;;  %s2419_s28 = scalar_lea.vmem %s6039_s6, %s5339_s29  ;;  %v2503_v26 = vld [vmem:[%s6040_s7 + $0x240] sm:$0xff] }
 0x104   :  { %v2420_v21 = vld [vmem:[%s2419_s28] sm:$0x1]  ;;  %s2423_s25 = scalar_lea.vmem %s6039_s6, %s5370_s19 }
 0x105   :  { %2093 = vmatpush1.bf16.msra.mxu1 %v4096_v40  ;;  %v2455_v40 = vld [vmem:[%s6040_s7 + $0xc0] sm:$0xff] }
 0x106   :  { %2175 = vmatpush1.bf16.msra.mxu0 %v4099_v41  ;;  %2094 = vmatprep.subr.bf16.mxu1 %v4104_v42  ;;  %v2370_v41 = vadd.f32 %v2369_v31, %v2366_v30  ;;  %v3639_v42 = vpack.c.bf16 %v2462_v35, %v2456_v33  ;;  %v2509_v30 = vld [vmem:[%s6040_s7 + $0x270] sm:$0xff]  ;;  %v2389_v31 = vld [vmem:[%s2388_s20] sm:$0x1]  ;;  %v2516_v35 = vld [vmem:[%s6040_s7 + $0x2a8] sm:$0xff] }
 0x107   :  { %2176 = vmatprep.subr.bf16.mxu0 %v4107_v43  ;;  %v2461_v43 = vld [vmem:[%s6040_s7 + $0xf0] sm:$0xff] }
 0x109   :  { %2095 = vmatpush1.bf16.msra.mxu1 %v4102_v44  ;;  %v2373_v44 = vld [vmem:[%s2372_s11] sm:$0x1]  ;;  %s2411_s11 = scalar_lea.vmem %s6039_s6, %s5276_s30 }
 0x10a   :  { %2177 = vmatpush1.bf16.msra.mxu0 %v4105_v45  ;;  %2096 = vmatprep.subr.bf16.mxu1 %v4110_v46  ;;  %v2408_v45 = vld [vmem:[%s2407_s23] sm:$0x1]  ;;  %v2468_v46 = vld [vmem:[%s6040_s7 + $0x128] sm:$0xff]  ;;  %s2415_s23 = scalar_lea.vmem %s6039_s6, %s5306_s0 }
 0x10b   :  { %2178 = vmatprep.subr.bf16.mxu0 %v4113_v48  ;;  %v2474_v48 = vld [vmem:[%s6040_s7 + $0x158] sm:$0xff] }
 0x10d   :  { %2097 = vmatpush1.bf16.msra.mxu1 %v4108_v49  ;;  %v4244_v49 = vmov 0.0  }
 0x10e   :  { %2179 = vmatpush1.bf16.msra.mxu0 %v4111_v50  ;;  %2098 = vmatprep.subr.bf16.mxu1 %v4116_v52  ;;  %v4156_v50 = vld [vmem:[%s6037_s4 + $0x670] ss:$24 sps:$4 sm:$0xff]   ;;  %v3641_v52 = vpack.c.bf16 %v2461_v43, %v2455_v40 }
 0x10f   :  { %2180 = vmatprep.subr.bf16.mxu0 %v4119_v53  ;;  %v4161_v53 = vld [vmem:[%s6037_s4 + $0x6a4] ss:$24 sps:$4 sm:$0xff]   ;;  %v4168_v40 = vld [vmem:[%s6037_s4 + $0x730] ss:$24 sps:$4 sm:$0xff]  }
 0x111   :  { %2099 = vmatpush1.bf16.msra.mxu1 %v4114_v54  ;;  %v2467_v54 = vld [vmem:[%s6040_s7 + $0x120] sm:$0xff] }
 0x112   :  { %2181 = vmatpush1.bf16.msra.mxu0 %v4117_v55  ;;  %2100 = vmatprep.subr.bf16.mxu1 %v4122_v56  ;;  %v2374_v55 = vadd.f32 %v2373_v44, %v2370_v41  ;;  %v3643_v56 = vpack.c.bf16 %v2474_v48, %v2468_v46  ;;  %v3657_v41 = vpack.c.bf16 %v2509_v30, %v2503_v26  ;;  %v2515_v46 = vld [vmem:[%s6040_s7 + $0x2a0] sm:$0xff]  ;;  %v2521_v48 = vld [vmem:[%s6040_s7 + $0x2d0] sm:$0xff] }
 0x113   :  { %2182 = vmatprep.subr.bf16.mxu0 %v4125_v57  ;;  %v2473_v57 = vld [vmem:[%s6040_s7 + $0x150] sm:$0xff]  ;;  %v2487_v30 = vld [vmem:[%s6040_s7 + $0x1c0] sm:$0xff] }
 0x115   :  { %2101 = vmatpush1.bf16.msra.mxu1 %v4120_v58  ;;  %v2377_v58 = vld [vmem:[%s2376_s18] sm:$0x1]  ;;  %s5372_s18 = sld [smem:[#allocation2 + $0x7]] }
 0x116   :  { %2183 = vmatpush1.bf16.msra.mxu0 %v4123_v59  ;;  %2102 = vmatprep.subr.bf16.mxu1 %v4128_v60  ;;  %v2412_v59 = vld [vmem:[%s2411_s11] sm:$0x1]  ;;  %v2480_v60 = vld [vmem:[%s6040_s7 + $0x188] sm:$0xff] }
 0x117   :  { %2184 = vmatprep.subr.bf16.mxu0 %v4131_v61  ;;  %v2486_v61 = vld [vmem:[%s6040_s7 + $0x1b8] sm:$0xff] }
 0x119   :  { %2103 = vmatpush1.bf16.msra.mxu1 %v4126_v62  ;;  %v4159_v62 = vld [vmem:[%s6037_s4 + $0x6a0] ss:$24 sps:$4 sm:$0xff]  }
 0x11a   :  { %2185 = vmatpush1.bf16.msra.mxu0 %v4129_v63  ;;  %2104 = vmatprep.subr.bf16.mxu1 %v4134_v0  ;;  %v3645_v63 = vpack.c.bf16 %v2473_v57, %v2467_v54  ;;  %v4164_v0 = vld [vmem:[%s6037_s4 + $0x6d4] ss:$24 sps:$4 sm:$0xff]   ;;  %v4171_v54 = vld [vmem:[%s6037_s4 + $0x760] ss:$24 sps:$4 sm:$0xff]  }
 0x11b   :  { %2186 = vmatprep.subr.bf16.mxu0 %v4137_v1  ;;  %v2479_v1 = vld [vmem:[%s6040_s7 + $0x180] sm:$0xff]  ;;  %s2392_s0 = scalar_lea.vmem %s6039_s6, %s5372_s18  ;;  %v4176_v57 = vld [vmem:[%s6037_s4 + $0x794] ss:$24 sps:$4 sm:$0xff]  }
 0x11d   :  { %2105 = vmatpush1.bf16.msra.mxu1 %v4132_v2  ;;  %v2378_v2 = vadd.f32 %v2377_v58, %v2374_v55  ;;  %v3661_v55 = vpack.c.bf16 %v2521_v48, %v2515_v46  ;;  %v4194_v46 = vld [vmem:[%s6037_s4 + $0x8b4] ss:$24 sps:$4 sm:$0xff]  }
 0x11e   :  { %2187 = vmatpush1.bf16.msra.mxu0 %v4135_v3  ;;  %2106 = vmatprep.subr.bf16.mxu1 %v4140_v4  ;;  %v3647_v4 = vpack.c.bf16 %v2486_v61, %v2480_v60  ;;  %v2439_v60 = vld [vmem:[%s6040_s7 + $0x40] sm:$0xff]  ;;  %v2446_v61 = vld [vmem:[%s6040_s7 + $0x78] sm:$0xff] }
 0x11f   :  { %2188 = vmatprep.subr.bf16.mxu0 %v4143_v5  ;;  %v2485_v5 = vld [vmem:[%s6040_s7 + $0x1b0] sm:$0xff] }
 0x120   :  { %v3649_v13 = vpack.c.bf16 %v2485_v5, %v2479_v1  ;;  %v2451_v5 = vld [vmem:[%s6040_s7 + $0xa0] sm:$0xff] }
 0x121   :  { %2107 = vmatpush1.bf16.msra.mxu1 %v4138_v8  ;;  %v2381_v8 = vld [vmem:[%s2380_s1] sm:$0x1] }
 0x122   :  { %2189 = vmatpush1.bf16.msra.mxu0 %v4141_v9  ;;  %2108 = vmatprep.subr.bf16.mxu1 %v4146_v10  ;;  %v2416_v9 = vld [vmem:[%s2415_s23] sm:$0x1]  ;;  %v2492_v10 = vld [vmem:[%s6040_s7 + $0x1e8] sm:$0xff] }
 0x123   :  { %2190 = vmatprep.subr.bf16.mxu0 %v4149_v11  ;;  %v2498_v11 = vld [vmem:[%s6040_s7 + $0x218] sm:$0xff] }
 0x125   :  { %2109 = vmatpush1.bf16.msra.mxu1 %v4144_v6  ;;  %v4167_v6 = vld [vmem:[%s6037_s4 + $0x704] ss:$24 sps:$4 sm:$0xff]  }
 0x126   :  { %2191 = vmatpush1.bf16.msra.mxu0 %v4147_v15  ;;  %3632 = vmatprep.subr.bf16.mxu1 %v3631_v18  ;;  %v2491_v15 = vld [vmem:[%s6040_s7 + $0x1e0] sm:$0xff]  ;;  %v3651_v18 = vpack.c.bf16 %v2498_v11, %v2492_v10 }
 0x127   :  { %2201 = vmatprep.subr.bf16.mxu0 %v4152_v16  ;;  %v2382_v16 = vadd.f32 %v2381_v8, %v2378_v2  ;;  %v4179_v2 = vld [vmem:[%s6037_s4 + $0x7c4] ss:$24 sps:$4 sm:$0xff]   ;;  %v4177_v10 = vld [vmem:[%s6037_s4 + $0x7c0] ss:$24 sps:$4 sm:$0xff]  }
 0x128   :  { %2111 = vmatmul.mubr.bf16.vlgmr.msra.gmra.mrb[4].mxu1 %v4761_v14  ;;  %v2458_v8 = vld [vmem:[%s6040_s7 + $0xd8] sm:$0xff] }
 0x129   :  { %2193 = vmatmul.mubr.bf16.vlgmr.msra.gmra.mrb[4].mxu0 %v4552_v7  ;;  %3634 = vmatpush1.bf16.msra.mxu1 %v3633_v25  ;;  %v2405_v7 = vadd.f32 %v2404_v32, %v2401_v28  ;;  %v3653_v25 = vpack.c.bf16 %v2497_v20, %v2491_v15  ;;  %v2386_v27 = vadd.f32 %v2385_v51, %v2382_v16  ;;  %v2424_v32 = vld [vmem:[%s2423_s25] sm:$0x1]  ;;  %v2470_v16 = vld [vmem:[%s6040_s7 + $0x138] sm:$0xff] }
 0x12a   :  { %2202 = vmatpush1.bf16.msra.mxu0 %v4150_v24  ;;  %3636 = vmatprep.subr.bf16.mxu1 %v3635_v29  ;;  %v4165_v24 = vld [vmem:[%s6037_s4 + $0x700] ss:$24 sps:$4 sm:$0xff]   ;;  %v3655_v29 = vpack.c.bf16 %v2510_v23, %v2504_v22  ;;  %v4185_v51 = vld [vmem:[%s6037_s4 + $0x824] ss:$24 sps:$4 sm:$0xff]   ;;  %v2469_v22 = vld [vmem:[%s6040_s7 + $0x130] sm:$0xff] }
 0x12b   :  { %2203 = vmatprep.subr.bf16.mxu0 %v4155_v47  ;;  %2623 = vmatprep.mubr.f32.mxu1 %v4244_v49  ;;  %v4170_v47 = vld [vmem:[%s6037_s4 + $0x734] ss:$24 sps:$4 sm:$0xff]   ;;  %v2463_v15 = vld [vmem:[%s6040_s7 + $0x100] sm:$0xff] }
 0x12c   :  { %2233 = vmatprep.mubr.bf16.mxu0 %v4639_v34  ;;  %v2409_v34 = vadd.f32 %v2408_v45, %v2405_v7  ;;  %v4173_v7 = vld [vmem:[%s6037_s4 + $0x764] ss:$24 sps:$4 sm:$0xff]  }
 0x12d   :  { %3638 = vmatpush1.bf16.msra.mxu1 %v3637_v37  ;;  %v2475_v23 = vld [vmem:[%s6040_s7 + $0x160] sm:$0xff] }
 0x12e   :  { %2204 = vmatpush1.bf16.msra.mxu0 %v4153_v36  ;;  %3640 = vmatprep.subr.bf16.mxu1 %v3639_v42  ;;  %v2413_v3 = vadd.f32 %v2412_v59, %v2409_v34  ;;  %v2522_v36 = vld [vmem:[%s6040_s7 + $0x2d8] sm:$0xff]  ;;  %v2390_v42 = vadd.f32 %v2389_v31, %v2386_v27  ;;  %v2433_v59 = vld [vmem:[%s6040_s7 + $0x10] sm:$0xff]  ;;  %v3677_v26 = vpack.c.bf16 %v2475_v23, %v2469_v22  ;;  %v2484_v22 = vld [vmem:[%s6040_s7 + $0x1a8] sm:$0xff] }
 0x12f   :  { %2205 = vmatprep.subr.bf16.mxu0 %v4158_v38  ;;  %v3659_v45 = vpack.c.bf16 %v2522_v36, %v2516_v35  ;;  %v3665_v1 = vpack.c.bf16 %v2439_v60, %v2433_v59  ;;  %v4188_v27 = vld [vmem:[%s6037_s4 + $0x854] ss:$24 sps:$4 sm:$0xff]   ;;  %v2494_v31 = vld [vmem:[%s6040_s7 + $0x1f8] sm:$0xff]  ;;  %v4186_v35 = vld [vmem:[%s6037_s4 + $0x850] ss:$24 sps:$4 sm:$0xff]  }
 0x130   :  { %v2417_v17 = vadd.f32 %v2416_v9, %v2413_v3  ;;  %v2464_v9 = vld [vmem:[%s6040_s7 + $0x108] sm:$0xff]  ;;  %v2523_v59 = vld [vmem:[%s6040_s7 + $0x2e0] sm:$0xff]  ;;  %v2490_v23 = vld [vmem:[%s6040_s7 + $0x1d8] sm:$0xff] }
 0x131   :  { %3642 = vmatpush1.bf16.msra.mxu1 %v3641_v52  ;;  %v2434_v52 = vld [vmem:[%s6040_s7 + $0x18] sm:$0xff]  ;;  %v2436_v60 = vld [vmem:[%s6040_s7 + $0x28] sm:$0xff] }
 0x132   :  { %2206 = vmatpush1.bf16.msra.mxu0 %v4156_v50  ;;  %3644 = vmatprep.subr.bf16.mxu1 %v3643_v56  ;;  %v2421_v28 = vadd.f32 %v2420_v21, %v2417_v17  ;;  %v2393_v50 = vld [vmem:[%s2392_s0] sm:$0x1]  ;;  %v2476_v17 = vld [vmem:[%s6040_s7 + $0x168] sm:$0xff] }
 0x133   :  { %2207 = vmatprep.subr.bf16.mxu0 %v4161_v53  ;;  %v2440_v53 = vld [vmem:[%s6040_s7 + $0x48] sm:$0xff]  ;;  %v2394_v34 = vadd.f32 %v2393_v50, %v2390_v42  ;;  %v3675_v21 = vpack.c.bf16 %v2476_v17, %v2470_v16  ;;  %v2506_v42 = vld [vmem:[%s6040_s7 + $0x258] sm:$0xff]  ;;  %v2505_v50 = vld [vmem:[%s6040_s7 + $0x250] sm:$0xff] }
 0x134   :  { %v2425_v43 = vadd.f32 %v2424_v32, %v2421_v28  ;;  %v3663_v58 = vpack.c.bf16 %v2440_v53, %v2434_v52  ;;  %v2500_v32 = vld [vmem:[%s6040_s7 + $0x228] sm:$0xff]  ;;  %v2511_v52 = vld [vmem:[%s6040_s7 + $0x280] sm:$0xff]  ;;  %v2518_v53 = vld [vmem:[%s6040_s7 + $0x2b8] sm:$0xff] }
 0x135   :  { %3646 = vmatpush1.bf16.msra.mxu1 %v3645_v63  ;;  %v4174_v63 = vld [vmem:[%s6037_s4 + $0x790] ss:$24 sps:$4 sm:$0xff]   ;;  %v2459_v16 = vld [vmem:[%s6040_s7 + $0xe0] sm:$0xff] }
 0x136   :  { %2208 = vmatpush1.bf16.msra.mxu0 %v4159_v62  ;;  %3648 = vmatprep.subr.bf16.mxu1 %v3647_v4  ;;  %v2427_v56 = vrot.slane %v2425_v43, 7  ;;  %v2452_v62 = vld [vmem:[%s6040_s7 + $0xa8] sm:$0xff]  ;;  %v2445_v4 = vld [vmem:[%s6040_s7 + $0x70] sm:$0xff] }
 0x137   :  { %2209 = vmatprep.subr.bf16.mxu0 %v4164_v0  ;;  %v3667_v3 = vpack.c.bf16 %v2452_v62, %v2446_v61  ;;  %v3669_v11 = vpack.c.bf16 %v2451_v5, %v2445_v4  ;;  %v2512_v43 = vld [vmem:[%s6040_s7 + $0x288] sm:$0xff]  ;;  %v2442_v61 = vld [vmem:[%s6040_s7 + $0x58] sm:$0xff]  ;;  %v2465_v17 = vld [vmem:[%s6040_s7 + $0x110] sm:$0xff] }
 0x138   :  { %v5492_v0 = vsel %vm2429_vm0, %v2394_v34, %v2427_v56  ;;  %v3687_v48 = vpack.c.bf16 %v2512_v43, %v2506_v42  ;;  %v3689_v34 = vpack.c.bf16 %v2511_v52, %v2505_v50  ;;  %v4197_v56 = vld [vmem:[%s6037_s4 + $0x8e4] ss:$24 sps:$4 sm:$0xff]   ;;  %v4195_v62 = vld [vmem:[%s6037_s4 + $0x8e0] ss:$24 sps:$4 sm:$0xff]   ;;  %v2448_v4 = vld [vmem:[%s6040_s7 + $0x88] sm:$0xff] }
 0x139   :  { %3650 = vmatpush1.bf16.msra.mxu1 %v3649_v13  ;;  %v3671_v13 = vpack.c.bf16 %v2464_v9, %v2458_v8  ;;  %v2454_v5 = vld [vmem:[%s6040_s7 + $0xb8] sm:$0xff]  ;;  %v2520_v52 = vld [vmem:[%s6040_s7 + $0x2c8] sm:$0xff] }
 0x13a   :  { %2210 = vmatpush1.bf16.msra.mxu0 %v4162_v12  ;;  %3652 = vmatprep.subr.bf16.mxu1 %v3651_v18  ;;  %v4182_v12 = vld [vmem:[%s6037_s4 + $0x7f4] ss:$24 sps:$4 sm:$0xff]   ;;  %v4180_v18 = vld [vmem:[%s6037_s4 + $0x7f0] ss:$24 sps:$4 sm:$0xff]   ;;  %v3699_v9 = vpack.c.bf16 %v2454_v5, %v2448_v4 }
 0x13b   :  { %2211 = vmatprep.subr.bf16.mxu0 %v4167_v6  ;;  %v5438_v33 = vpop.f32.mrb[0].mxu1  ;;  %v2457_v6 = vld [vmem:[%s6040_s7 + $0xd0] sm:$0xff] }
 0x13c   :  { %v5450_v37 = vpop.f32.mrb[1].mxu1  ;;  %v3673_v20 = vpack.c.bf16 %v2463_v15, %v2457_v6 }
 0x13d   :  { %v1911_v38 = vpop.f32.mrb[2].mxu1  ;;  %3654 = vmatpush1.bf16.msra.mxu1 %v3653_v25  ;;  %v2488_v25 = vld [vmem:[%s6040_s7 + $0x1c8] sm:$0xff] }
 0x13e   :  { %2212 = vmatpush1.bf16.msra.mxu0 %v4165_v24  ;;  %v1912_v44 = vpop.f32.mrb[3].mxu1  ;;  %3656 = vmatprep.subr.bf16.mxu1 %v3655_v29  ;;  %v2482_v24 = vld [vmem:[%s6040_s7 + $0x198] sm:$0xff]  ;;  %v2481_v29 = vld [vmem:[%s6040_s7 + $0x190] sm:$0xff] }
 0x13f   :  { %2213 = vmatprep.subr.bf16.mxu0 %v4170_v47  ;;  %v4183_v47 = vld [vmem:[%s6037_s4 + $0x820] ss:$24 sps:$4 sm:$0xff]   ;;  %v3679_v28 = vpack.c.bf16 %v2488_v25, %v2482_v24  ;;  %v3681_v36 = vpack.c.bf16 %v2487_v30, %v2481_v29  ;;  %v4191_v38 = vld [vmem:[%s6037_s4 + $0x884] ss:$24 sps:$4 sm:$0xff]   ;;  %v3711_v25 = vpack.c.bf16 %v2490_v23, %v2484_v22  ;;  %v2496_v29 = vld [vmem:[%s6040_s7 + $0x208] sm:$0xff] }
 0x140   :  { %v4189_v44 = vld [vmem:[%s6037_s4 + $0x880] ss:$24 sps:$4 sm:$0xff]  }
 0x141   :  { %3658 = vmatpush1.bf16.msra.mxu1 %v3657_v41  ;;  %v2493_v41 = vld [vmem:[%s6040_s7 + $0x1f0] sm:$0xff]  ;;  %v2502_v30 = vld [vmem:[%s6040_s7 + $0x238] sm:$0xff] }
 0x142   :  { %2214 = vmatpush1.bf16.msra.mxu0 %v4168_v40  ;;  %3660 = vmatprep.subr.bf16.mxu1 %v3659_v45  ;;  %v3683_v40 = vpack.c.bf16 %v2500_v32, %v2494_v31 }
 0x143   :  { %2215 = vmatprep.subr.bf16.mxu0 %v4173_v7  ;;  %v2499_v7 = vld [vmem:[%s6040_s7 + $0x220] sm:$0xff] }
 0x144   :  { %v3685_v45 = vpack.c.bf16 %v2499_v7, %v2493_v41  ;;  %v2508_v41 = vld [vmem:[%s6040_s7 + $0x268] sm:$0xff]  ;;  %v2514_v7 = vld [vmem:[%s6040_s7 + $0x298] sm:$0xff] }
 0x145   :  { %3662 = vmatpush1.bf16.msra.mxu1 %v3661_v55  ;;  %v4192_v55 = vld [vmem:[%s6037_s4 + $0x8b0] ss:$24 sps:$4 sm:$0xff]  }
 0x146   :  { %2216 = vmatpush1.bf16.msra.mxu0 %v4171_v54  ;;  %3664 = vmatprep.subr.bf16.mxu1 %v3663_v58  ;;  %v2524_v54 = vld [vmem:[%s6040_s7 + $0x2e8] sm:$0xff]  ;;  %v2517_v58 = vld [vmem:[%s6040_s7 + $0x2b0] sm:$0xff] }
 0x147   :  { %2217 = vmatprep.subr.bf16.mxu0 %v4176_v57  ;;  %v3691_v57 = vpack.c.bf16 %v2524_v54, %v2518_v53 }
 0x148   :  { %2624 = vmatmul.mubr.f32.vlgmr.msra.gmra.mrb[8].mxu1 %v5492_v0 }
 0x149   :  { %3666 = vmatpush1.bf16.msra.mxu1 %v3665_v1  ;;  %2694 = vmatprep.mubr.f32.mxu1 %v4244_v49  ;;  %v3695_v1 = vpack.c.bf16 %v2442_v61, %v2436_v60 }
 0x14a   :  { %2218 = vmatpush1.bf16.msra.mxu0 %v4174_v63  ;;  %3668 = vmatprep.subr.bf16.mxu1 %v3667_v3  ;;  %v3693_v63 = vpack.c.bf16 %v2523_v59, %v2517_v58  ;;  %v2441_v3 = vld [vmem:[%s6040_s7 + $0x50] sm:$0xff] }
 0x14b   :  { %2219 = vmatprep.subr.bf16.mxu0 %v4179_v2  ;;  %v2435_v2 = vld [vmem:[%s6040_s7 + $0x20] sm:$0xff]  ;;  %v2525_v58 = vld [vmem:[%s6040_s7 + $0x2f0] sm:$0xff] }
 0x14c   :  { %v3697_v8 = vpack.c.bf16 %v2441_v3, %v2435_v2  ;;  %v5734_v3 = vsub.s32 3, %v4959_v19 }
 0x14d   :  { %3670 = vmatpush1.bf16.msra.mxu1 %v3669_v11  ;;  %v2453_v11 = vld [vmem:[%s6040_s7 + $0xb0] sm:$0xff] }
 0x14e   :  { %2220 = vmatpush1.bf16.msra.mxu0 %v4177_v10  ;;  %3672 = vmatprep.subr.bf16.mxu1 %v3671_v13  ;;  %v2447_v10 = vld [vmem:[%s6040_s7 + $0x80] sm:$0xff]  ;;  %v2466_v13 = vld [vmem:[%s6040_s7 + $0x118] sm:$0xff] }
 0x14f   :  { %2221 = vmatprep.subr.bf16.mxu0 %v4182_v12  ;;  %v2460_v12 = vld [vmem:[%s6040_s7 + $0xe8] sm:$0xff]  ;;  %v3701_v6 = vpack.c.bf16 %v2453_v11, %v2447_v10 }
 0x150   :  { %v3703_v15 = vpack.c.bf16 %v2466_v13, %v2460_v12 }
 0x151   :  { %3674 = vmatpush1.bf16.msra.mxu1 %v3673_v20 }
 0x152   :  { %2222 = vmatpush1.bf16.msra.mxu0 %v4180_v18  ;;  %3676 = vmatprep.subr.bf16.mxu1 %v3675_v21  ;;  %v2478_v18 = vld [vmem:[%s6040_s7 + $0x178] sm:$0xff]  ;;  %v2477_v21 = vld [vmem:[%s6040_s7 + $0x170] sm:$0xff] }
 0x153   :  { %2223 = vmatprep.subr.bf16.mxu0 %v4185_v51  ;;  %v2471_v51 = vld [vmem:[%s6040_s7 + $0x140] sm:$0xff] }
 0x154   :  { %v3709_v24 = vpack.c.bf16 %v2477_v21, %v2471_v51 }
 0x155   :  { %3678 = vmatpush1.bf16.msra.mxu1 %v3677_v26  ;;  %v2489_v26 = vld [vmem:[%s6040_s7 + $0x1d0] sm:$0xff] }
 0x156   :  { %2224 = vmatpush1.bf16.msra.mxu0 %v4183_v47  ;;  %3680 = vmatprep.subr.bf16.mxu1 %v3679_v28  ;;  %v2483_v47 = vld [vmem:[%s6040_s7 + $0x1a0] sm:$0xff]  ;;  %v5685_v28 = vsub.s32 1, %v4959_v19 }
 0x157   :  { %2225 = vmatprep.subr.bf16.mxu0 %v4188_v27  ;;  %v5682_v27 = vld [vmem:[%s6038_s5] sm:$0x3f]  ;;  %v3713_v31 = vpack.c.bf16 %v2489_v26, %v2483_v47 }
 0x158   :  { %v385_v32 = vrot.slane %v5682_v27, %v4993_v39 }
 0x159   :  { %3682 = vmatpush1.bf16.msra.mxu1 %v3681_v36  ;;  %v2495_v36 = vld [vmem:[%s6040_s7 + $0x200] sm:$0xff] }
 0x15a   :  { %2226 = vmatpush1.bf16.msra.mxu0 %v4186_v35  ;;  %3684 = vmatprep.subr.bf16.mxu1 %v3683_v40  ;;  %v3715_v35 = vpack.c.bf16 %v2502_v30, %v2496_v29  ;;  %v389_v40 = vrot.slane %v5682_v27, %v5685_v28  ;;  %v1908_v43 = vadd.f32 %v5438_v33, %v385_v32  ;;  %v2526_v33 = vld [vmem:[%s6040_s7 + $0x2f8] sm:$0xff]  ;;  %v5756_v29 = vsub.s32 4, %v4959_v19 }
 0x15b   :  { %2227 = vmatprep.subr.bf16.mxu0 %v4191_v38  ;;  %v2501_v38 = vld [vmem:[%s6040_s7 + $0x230] sm:$0xff]  ;;  %v5759_v30 = vsub.s32 5, %v4959_v19 }
 0x15c   :  { %v3717_v42 = vpack.c.bf16 %v2501_v38, %v2495_v36 }
 0x15d   :  { %3686 = vmatpush1.bf16.msra.mxu1 %v3685_v45  ;;  %v2507_v45 = vld [vmem:[%s6040_s7 + $0x260] sm:$0xff]  ;;  %v405_v32 = vrot.slane %v5682_v27, %v5759_v30 }
 0x15e   :  { %2228 = vmatpush1.bf16.msra.mxu0 %v4189_v44  ;;  %3688 = vmatprep.subr.bf16.mxu1 %v3687_v48  ;;  %v3719_v44 = vpack.c.bf16 %v2514_v7, %v2508_v41  ;;  %v1910_v48 = vadd.f32 %v5450_v37, %v389_v40  ;;  %v2519_v37 = vld [vmem:[%s6040_s7 + $0x2c0] sm:$0xff] }
 0x15f   :  { %2229 = vmatprep.subr.bf16.mxu0 %v4194_v46  ;;  %v2513_v46 = vld [vmem:[%s6040_s7 + $0x290] sm:$0xff] }
 0x161   :  { %3690 = vmatpush1.bf16.msra.mxu1 %v3689_v34  ;;  %v3721_v34 = vpack.c.bf16 %v2513_v46, %v2507_v45 }
 0x162   :  { %2230 = vmatpush1.bf16.msra.mxu0 %v4192_v55  ;;  %3692 = vmatprep.subr.bf16.mxu1 %v3691_v57  ;;  %v3723_v57 = vpack.c.bf16 %v2526_v33, %v2520_v52 }
 0x163   :  { %2231 = vmatprep.subr.bf16.mxu0 %v4197_v56 }
 0x165   :  { %3694 = vmatpush1.bf16.msra.mxu1 %v3693_v63  ;;  %v5731_v63 = vsub.s32 2, %v4959_v19 }
 0x166   :  { %2232 = vmatpush1.bf16.msra.mxu0 %v4195_v62  ;;  %3696 = vmatprep.subr.bf16.mxu1 %v3695_v1  ;;  %v3725_v62 = vpack.c.bf16 %v2525_v58, %v2519_v37  ;;  %v4245_v1 = vmov 1966171168  }
 0x167   :  { %v2255_v2 = vunpack.c.l.s4 %v4245_v1  ;;  %v393_v4 = vrot.slane %v5682_v27, %v5731_v63 }
 0x168   :  { %2695 = vmatmul.mubr.f32.vlgmr.msra.gmra.mrb[10].mxu1 %v5492_v0 }
 0x169   :  { %2234 = vmatmul.mubr.bf16.vlgmr.msra.gmra.mrb[4].mxu0 %v4761_v14  ;;  %3698 = vmatpush1.bf16.msra.mxu1 %v3697_v8  ;;  %v2472_v14 = vld [vmem:[%s6040_s7 + $0x148] sm:$0xff]  ;;  %v2256_v5 = vunpack.c.0.s8 %v2255_v2  ;;  %v397_v8 = vrot.slane %v5682_v27, %v5734_v3 }
 0x16a   :  { %2765 = vmatprep.mubr.f32.mxu1 %v4244_v49  ;;  %3700 = vmatprep.subr.bf16.mxu1 %v3699_v9  ;;  %v3705_v49 = vpack.c.bf16 %v2465_v17, %v2459_v16  ;;  %v3707_v20 = vpack.c.bf16 %v2478_v18, %v2472_v14 }
 0x16d   :  { %3702 = vmatpush1.bf16.msra.mxu1 %v3701_v6 }
 0x16e   :  { %3704 = vmatprep.subr.bf16.mxu1 %v3703_v15 }
 0x171   :  { %3706 = vmatpush1.bf16.msra.mxu1 %v3705_v49 }
 0x172   :  { %3708 = vmatprep.subr.bf16.mxu1 %v3707_v20 }
 0x175   :  { %3710 = vmatpush1.bf16.msra.mxu1 %v3709_v24 }
 0x176   :  { %3712 = vmatprep.subr.bf16.mxu1 %v3711_v25 }
 0x179   :  { %3714 = vmatpush1.bf16.msra.mxu1 %v3713_v31  ;;  %v401_v31 = vrot.slane %v5682_v27, %v5756_v29 }
 0x17a   :  { %3716 = vmatprep.subr.bf16.mxu1 %v3715_v35 }
 0x17c   :  { %v1989_v50 = vpop.f32.mrb[0].mxu0 }
 0x17d   :  { %v3728_v53 = vadd.f32 %v1989_v50, %v1908_v43  ;;  %v1991_v54 = vpop.f32.mrb[1].mxu0  ;;  %3718 = vmatpush1.bf16.msra.mxu1 %v3717_v42 }
 0x17e   :  { %v3730_v55 = vadd.f32 %v1991_v54, %v1910_v48  ;;  %v1993_v56 = vpop.f32.mrb[2].mxu0  ;;  %3720 = vmatprep.subr.bf16.mxu1 %v3719_v44 }
 0x17f   :  { %v1994_v59 = vpop.f32.mrb[3].mxu0 }
 0x180   :  { %v2248_v60 = vcombine.low %v3728_v53, %v3730_v55  ;;  %v2249_v61 = vcombine.high %v3728_v53, %v3730_v55 }
 0x181   :  { %3722 = vmatpush1.bf16.msra.mxu1 %v3721_v34 }
 0x182   :  { %3724 = vmatprep.subr.bf16.mxu1 %v3723_v57  ;;  %v2527_v57 = vld [vmem:[%s6041_s8] sm:$0x3f] }
 0x183   :  { %v2540_v1 = vrot.slane %v2527_v57, %v5731_v63 }
 0x185   :  { %3726 = vmatpush1.bf16.msra.mxu1 %v3725_v62  ;;  %v2536_v62 = vrot.slane %v2527_v57, %v5685_v28 }
 0x188   :  { %2766 = vmatmul.mubr.f32.vlgmr.msra.gmra.mrb[12].mxu1 %v5492_v0  ;;  %v5741_v0 = vsub.s32 %v2256_v5, %v4959_v19 }
 0x18a   :  { %v2260_v17 = vrot.slane %v2248_v60, %v5741_v0  ;;  %v2267_v14 = vrot.slane %v2249_v61, %v5741_v0  ;;  %v2532_v61 = vrot.slane %v2527_v57, %v4993_v39 }
 0x1fb   :  { %v2112_v9 = vpop.f32.mrb[4].mxu1 }
 0x1fc   :  { %v3731_v10 = vadd.f32 %v2112_v9, %v393_v4  ;;  %v2114_v11 = vpop.f32.mrb[5].mxu1 }
 0x1fd   :  { %v3732_v12 = vadd.f32 %v2114_v11, %v397_v8  ;;  %v2116_v13 = vpop.f32.mrb[6].mxu1  ;;  %v2544_v8 = vrot.slane %v2527_v57, %v5734_v3 }
 0x1fe   :  { %v2117_v6 = vpop.f32.mrb[7].mxu1 }
 0x1ff   :  { %v2250_v15 = vcombine.low %v3731_v10, %v3732_v12  ;;  %v2251_v16 = vcombine.high %v3731_v10, %v3732_v12 }
 0x201   :  { %v2274_v18 = vrot.slane %v2250_v15, %v5741_v0  ;;  %v2281_v49 = vrot.slane %v2251_v16, %v5741_v0 }
 0x203   :  { %v2296_v20 = vcombine.low %v2260_v17, %v2274_v18  ;;  %v2297_v51 = vcombine.high %v2260_v17, %v2274_v18  ;;  %v2298_v21 = vcombine.low %v2267_v14, %v2281_v49  ;;  %v2299_v22 = vcombine.high %v2267_v14, %v2281_v49 }
 0x204   :  { %v2548_v17 = vrot.slane %v2527_v57, %v5756_v29  ;;  %v2552_v18 = vrot.slane %v2527_v57, %v5759_v30 }
 0x205   :  { %v5748_v23 = vrot.slane %v2296_v20, %v5741_v0  ;;  %v5751_v24 = vrot.slane %v2297_v51, %v5741_v0  ;;  %v2315_v48 = vrot.slane %v2298_v21, %v5741_v0  ;;  %v2329_v53 = vrot.slane %v2299_v22, %v5741_v0 }
 0x207   :  { %v3627_v25 = vcombine.low %v5748_v23, %v5751_v24 }
 0x21b   :  { %v2625_v47 = vpop.f32.mrb[8].mxu1 }
 0x21c   :  { %v2627_v26 = vpop.f32.mrb[9].mxu1  ;;  %v5797_v2 = vadd.f32 %v2625_v47, %v2532_v61 }
 0x21d   :  { %v5799_v4 = vadd.f32 %v2627_v26, %v2536_v62 }
 0x21e   :  { %v2772_v9 = vmul.f32 %v5797_v2, %v5797_v2 }
 0x21f   :  { %v2773_v10 = vmul.f32 %v5799_v4, %v5799_v4 }
 0x220   :  { %v2779_v13 = vsel %vm2778_vm3, %v2772_v9, 0.0 }
 0x221   :  { %v2780_v6 = vsel %vm2778_vm3, %v2773_v10, 0.0 }
 0x222   :  { %v2781_v14 = vadd.f32 %v2780_v6, %v2779_v13 }
 0x23b   :  { %v2696_v36 = vpop.f32.mrb[10].mxu1 }
 0x23c   :  { %v2235_v35 = vpop.f32.mrb[4].mxu0  ;;  %v2698_v41 = vpop.f32.mrb[11].mxu1  ;;  %v5801_v5 = vadd.f32 %v2696_v36, %v2540_v1 }
 0x23d   :  { %v3733_v38 = vadd.f32 %v2235_v35, %v401_v31  ;;  %v2237_v40 = vpop.f32.mrb[5].mxu0  ;;  %v5810_v12 = vadd.f32 %v2698_v41, %v2544_v8  ;;  %v2979_v41 = vrot.slane %v3627_v25, %v5741_v0 }
 0x23e   :  { %v3734_v7 = vadd.f32 %v2237_v40, %v405_v32  ;;  %v2239_v42 = vpop.f32.mrb[6].mxu0  ;;  %v2774_v11 = vmul.f32 %v5801_v5, %v5801_v5 }
 0x23f   :  { %v2240_v43 = vpop.f32.mrb[7].mxu0  ;;  %v2775_v16 = vmul.f32 %v5810_v12, %v5810_v12 }
 0x240   :  { %v2252_v44 = vcombine.low %v3733_v38, %v3734_v7  ;;  %v2253_v45 = vcombine.high %v3733_v38, %v3734_v7  ;;  %v2782_v15 = vsel %vm2778_vm3, %v2774_v11, 0.0  ;;  %v2987_v7 = vcombine.high %v2979_v41, %v2979_v41 }
 0x241   :  { %v2783_v49 = vadd.f32 %v2782_v15, %v2781_v14  ;;  %v2784_v51 = vsel %vm2778_vm3, %v2775_v16, 0.0  ;;  %v5835_v43 = vrot.slane %v2979_v41, %v5741_v0 }
 0x242   :  { %v2288_v46 = vrot.slane %v2252_v44, %v5741_v0  ;;  %v2295_v19 = vrot.slane %v2253_v45, %v5741_v0  ;;  %v5838_v44 = vrot.slane %v2987_v7, %v5741_v0 }
 0x243   :  { %v2785_v32 = vadd.f32 %v2784_v51, %v2783_v49 }
 0x244   :  { %v2300_v50 = vcombine.high %v2288_v46, %v2288_v46  ;;  %v2301_v52 = vcombine.high %v2295_v19, %v2295_v19  ;;  %v5769_v27 = vrot.slane %v2288_v46, %v5741_v0  ;;  %v2343_v33 = vrot.slane %v2295_v19, %v5741_v0  ;;  %v4200_v46 = vld [vmem:[%s6046_s13] sm:$0xff] }
 0x245   :  { %v3121_v19 = vrot.slane %v4200_v46, %v4993_v39  ;;  %v3149_v8 = vrot.slane %v5838_v44, 7 }
 0x246   :  { %v5774_v54 = vrot.slane %v2300_v50, %v5741_v0  ;;  %v2357_v55 = vrot.slane %v2301_v52, %v5741_v0  ;;  %v5779_v34 = vcombine.high %v5748_v23, %v5769_v27  ;;  %v5781_v56 = vcombine.low %v2315_v48, %v2343_v33 }
 0x247   :  { %v3129_v23 = vrot.slane %v4200_v46, %v5731_v63  ;;  %v3137_v50 = vrot.slane %v4200_v46, %v5756_v29  ;;  %v3141_v52 = vrot.slane %v4200_v46, %v5759_v30  ;;  %v3017_v33 = vcombine.high %v5835_v43, %v5835_v43 }
 0x248   :  { %v2362_v37 = vcombine.high %v5751_v24, %v5774_v54  ;;  %v5788_v58 = vcombine.low %v2329_v53, %v2357_v55  ;;  %v3630_v59 = vcombine.high %v5774_v54, %v5781_v56  ;;  %v3133_v24 = vrot.slane %v4200_v46, %v5734_v3 }
 0x249   :  { %v3628_v25 = vcombine.low %v5769_v27, %v5774_v54  ;;  %v3018_v53 = vcombine.high %v5838_v44, %v5838_v44  ;;  %v5855_v55 = vrot.slane %v3121_v19, 4  ;;  %v5859_v57 = vrot.slane %v3129_v23, 4 }
 0x24a   :  { %v5792_v60 = vcombine.low %v2362_v37, %v2315_v48  ;;  %v3125_v48 = vrot.slane %v4200_v46, %v5685_v28  ;;  %v5861_v37 = vrot.slane %v3133_v24, 4  ;;  %v3148_v54 = vrot.slane %v5835_v43, 7 }
 0x24b   :  { %v2986_v27 = vrot.slane %v3628_v25, %v5741_v0  ;;  %v5865_v61 = vrot.slane %v3137_v50, 4  ;;  %v3034_v62 = vrot.slane %v3630_v59, %v5741_v0  ;;  %v5868_v1 = vrot.slane %v3141_v52, 4 }
 0x24c   :  { %v5857_v56 = vrot.slane %v3125_v48, 4  ;;  %v5871_v9 = vrot.slane %v3017_v33, 7  ;;  %v5873_v10 = vrot.slane %v3018_v53, 7  ;;  %v3027_v11 = vrot.slane %v5792_v60, %v5741_v0 }
 0x24d   :  { %v3071_v13 = vrot.slane %v5779_v34, %v4993_v39  ;;  %v3075_v6 = vrot.slane %v5779_v34, %v5685_v28  ;;  %v3079_v59 = vrot.slane %v5779_v34, %v5731_v63  ;;  %v3083_v15 = vrot.slane %v5779_v34, %v5734_v3 }
 0x24e   :  { %v2988_v16 = vcombine.high %v2986_v27, %v2986_v27  ;;  %v3091_v14 = vrot.slane %v5779_v34, %v5759_v30  ;;  %v3095_v60 = vrot.slane %v5788_v58, %v4993_v39  ;;  %v3036_v49 = vcombine.high %v3034_v62, %v3034_v62 }
 0x24f   :  { %v3103_v51 = vrot.slane %v5788_v58, %v5731_v63  ;;  %v5909_v7 = vrot.slane %v3027_v11, %v5741_v0  ;;  %v3180_v24 = vrot.slane %v3071_v13, 5  ;;  %v3181_v25 = vrot.slane %v3075_v6, 5 }
 0x250   :  { %v5906_v41 = vrot.slane %v2988_v16, %v5741_v0  ;;  %v5914_v46 = vrot.slane %v3036_v49, %v5741_v0  ;;  %v3183_v6 = vrot.slane %v3083_v15, 5 }
 0x252   :  { %v3153_v52 = vrot.slane %v5906_v41, 7  ;;  %v3161_v53 = vrot.slane %v5914_v46, 7 }
 0x25b   :  { %v2767_v20 = vpop.f32.mrb[12].mxu1 }
 0x25c   :  { %v5820_v21 = vadd.f32 %v2767_v20, %v2548_v17  ;;  %v2769_v22 = vpop.f32.mrb[13].mxu1  ;;  %v3087_v17 = vrot.slane %v5779_v34, %v5756_v29  ;;  %v3099_v20 = vrot.slane %v5788_v58, %v5685_v28  ;;  %v3111_v34 = vrot.slane %v5788_v58, %v5756_v29 }
 0x25d   :  { %v5822_v47 = vadd.f32 %v2769_v22, %v2552_v18  ;;  %v3002_v18 = vrot.slane %v2986_v27, %v5741_v0  ;;  %v3182_v27 = vrot.slane %v3079_v59, 5  ;;  %v3190_v59 = vrot.slane %v3103_v51, 5 }
 0x25e   :  { %v2776_v26 = vmul.f32 %v5820_v21, %v5820_v21  ;;  %v3184_v16 = vrot.slane %v3087_v17, 5  ;;  %v3189_v41 = vrot.slane %v3099_v20, 5  ;;  %v3192_v15 = vrot.slane %v3111_v34, 5 }
 0x25f   :  { %v2777_v31 = vmul.f32 %v5822_v47, %v5822_v47  ;;  %v3152_v19 = vrot.slane %v3002_v18, 7 }
 0x260   :  { %v2786_v35 = vsel %vm2778_vm3, %v2776_v26, 0.0  ;;  %v3035_v26 = vcombine.high %v3027_v11, %v3027_v11 }
 0x261   :  { %v2787_v36 = vadd.f32 %v2786_v35, %v2785_v32  ;;  %v2788_v38 = vsel %vm2778_vm3, %v2777_v31, 0.0  ;;  %v3050_v31 = vrot.slane %v3034_v62, %v5741_v0  ;;  %v3107_v32 = vrot.slane %v5788_v58, %v5734_v3 }
 0x263   :  { %v2789_v40 = vadd.f32 %v2788_v38, %v2787_v36  ;;  %v3160_v48 = vrot.slane %v3050_v31, 7 }
 0x265   :  { %2790 = vadd.xlane.f32.xlu0 %v2789_v40 }
 0x2f2   :  { %v2791_v42 = vpop.xlane.xlu0 %2790 }
 0x2f3   :  { %v2792_v45 = vadd.f32 1e-12, %v2791_v42 }
 0x2f5   :  { %4198 = vrsqrt.f32 %v2792_v45 }
 0x2ff   :  { %v4199_v22 = vpop.eup %4198 }
 0x300   :  { %v2794_v35 = vmul.f32 %v4199_v22, %v5797_v2  ;;  %v2795_v36 = vmul.f32 %v4199_v22, %v5799_v4  ;;  %v2796_v38 = vmul.f32 %v4199_v22, %v5801_v5  ;;  %v2797_v40 = vmul.f32 %v4199_v22, %v5810_v12 }
 0x301   :  { %v2798_v42 = vmul.f32 %v4199_v22, %v5820_v21  ;;  %v2799_v45 = vmul.f32 %v4199_v22, %v5822_v47  ;;  %v3115_v2 = vrot.slane %v5788_v58, %v5759_v30  ;;  %v3057_v12 = vrot.slane %v3035_v26, %v5741_v0 }
 0x302   :  { %v2846_v4 = vcombine.low %v2794_v35, %v2795_v36  ;;  %v2847_v5 = vcombine.low %v2796_v38, %v2797_v40  ;;  %v3065_v47 = vcombine.high %v5909_v7, %v5909_v7  ;;  %v3156_v58 = vrot.slane %v5909_v7, 7 }
 0x303   :  { %v2848_v23 = vcombine.low %v2798_v42, %v2799_v45  ;;  %v3066_v13 = vcombine.high %v3057_v12, %v3057_v12  ;;  %v3157_v49 = vrot.slane %v3057_v12, 7  ;;  %v3185_v36 = vrot.slane %v3091_v14, 5 }
 0x304   :  { %v2855_v50 = vrot.slane %v2846_v4, %v5741_v0  ;;  %v2862_v21 = vrot.slane %v2847_v5, %v5741_v0  ;;  %v3158_v35 = vrot.slane %v3065_v47, 7  ;;  %v3188_v38 = vrot.slane %v3095_v60, 5 }
 0x305   :  { %v2869_v33 = vrot.slane %v2848_v23, %v5741_v0  ;;  %v3191_v7 = vrot.slane %v3107_v32, 5  ;;  %v3159_v45 = vrot.slane %v3066_v13, 7  ;;  %v3193_v17 = vrot.slane %v3115_v2, 5 }
 0x306   :  { %v2870_v62 = vcombine.low %v2855_v50, %v2862_v21  ;;  %v2871_v11 = vcombine.high %v2855_v50, %v2862_v21 }
 0x307   :  { %v2872_v18 = vcombine.high %v2869_v33, %v2869_v33  ;;  %v2893_v31 = vrot.slane %v2869_v33, %v5741_v0 }
 0x308   :  { %v2879_v22 = vrot.slane %v2870_v62, %v5741_v0  ;;  %v2886_v26 = vrot.slane %v2871_v11, %v5741_v0 }
 0x309   :  { %v2900_v40 = vrot.slane %v2872_v18, %v5741_v0 }
 0x30a   :  { %v2901_v42 = vcombine.low %v2879_v22, %v2893_v31 }
 0x30b   :  { %v2902_v46 = vcombine.low %v2886_v26, %v2900_v40 }
 0x30c   :  { %v2908_v4 = vrot.slane %v2901_v42, %v4993_v39  ;;  %v2912_v5 = vrot.slane %v2901_v42, %v5685_v28  ;;  %v2916_v12 = vrot.slane %v2901_v42, %v5731_v63  ;;  %v2920_v23 = vrot.slane %v2901_v42, %v5734_v3 }
 0x30d   :  { %v2924_v14 = vrot.slane %v2901_v42, %v5756_v29  ;;  %v2928_v0 = vrot.slane %v2901_v42, %v5759_v30  ;;  %v2932_v60 = vrot.slane %v2902_v46, %v4993_v39  ;;  %v2936_v20 = vrot.slane %v2902_v46, %v5685_v28 }
 0x30e   :  { %v2940_v51 = vrot.slane %v2902_v46, %v5731_v63  ;;  %v2944_v32 = vrot.slane %v2902_v46, %v5734_v3  ;;  %v2948_v34 = vrot.slane %v2902_v46, %v5756_v29  ;;  %v2952_v2 = vrot.slane %v2902_v46, %v5759_v30 }
 0x30f   :  { %v3228_v50 = vsel %vm2429_vm0, %v2908_v4, %v3148_v54  ;;  %v3229_v21 = vsel %vm2429_vm0, %v2912_v5, %v3149_v8  ;;  %v3230_v39 = vsel %vm2429_vm0, %v2916_v12, %v5871_v9  ;;  %v3231_v28 = vsel %vm2429_vm0, %v2920_v23, %v5873_v10 }
 0x310   :  { %v3232_v63 = vsel %vm2429_vm0, %v2924_v14, %v3152_v19  ;;  %v3233_v3 = vsel %vm2429_vm0, %v2928_v0, %v3153_v52  ;;  %v3236_v29 = vsel %vm2429_vm0, %v2932_v60, %v3156_v58  ;;  %v3237_v30 = vsel %vm2429_vm0, %v2936_v20, %v3157_v49 }
 0x311   :  { %v3238_v43 = vsel %vm2429_vm0, %v2940_v51, %v3158_v35  ;;  %v3239_v44 = vsel %vm2429_vm0, %v2944_v32, %v3159_v45  ;;  %v3240_v54 = vsel %vm2429_vm0, %v2948_v34, %v3160_v48  ;;  %v3241_v8 = vsel %vm2429_vm0, %v2952_v2, %v3161_v53 }
 0x312   :  { %v3244_v9 = vsel %vm3243_vm1, %v3228_v50, %v3180_v24  ;;  %v3245_v10 = vsel %vm3243_vm1, %v3229_v21, %v3181_v25  ;;  %v3246_v19 = vsel %vm3243_vm1, %v3230_v39, %v3182_v27  ;;  %v3247_v47 = vsel %vm3243_vm1, %v3231_v28, %v3183_v6 }
 0x313   :  { %v3248_v52 = vsel %vm3243_vm1, %v3232_v63, %v3184_v16  ;;  %v3249_v58 = vsel %vm3243_vm1, %v3233_v3, %v3185_v36  ;;  %v3252_v33 = vsel %vm3243_vm1, %v3236_v29, %v3188_v38  ;;  %v3253_v62 = vsel %vm3243_vm1, %v3237_v30, %v3189_v41 }
 0x314   :  { %v3254_v48 = vsel %vm3243_vm1, %v3238_v43, %v3190_v59  ;;  %v3255_v53 = vsel %vm3243_vm1, %v3239_v44, %v3191_v7  ;;  %v3256_v24 = vsel %vm3243_vm1, %v3240_v54, %v3192_v15  ;;  %v3257_v25 = vsel %vm3243_vm1, %v3241_v8, %v3193_v17 }
 0x315   :  { %v3260_v27 = vsel %vm3259_vm2, %v3244_v9, %v5855_v55  ;;  %v3261_v11 = vsel %vm3259_vm2, %v3245_v10, %v5857_v56  ;;  %v3262_v13 = vsel %vm3259_vm2, %v3246_v19, %v5859_v57  ;;  %v3263_v6 = vsel %vm3259_vm2, %v3247_v47, %v5861_v37 }
 0x316   :  { %v3264_v16 = vsel %vm3259_vm2, %v3248_v52, %v5865_v61  ;;  %v3265_v18 = vsel %vm3259_vm2, %v3249_v58, %v5868_v1  ;;  %v3268_v49 = vsel %vm3259_vm2, %v3252_v33, %v5855_v55  ;;  %v3269_v22 = vsel %vm3259_vm2, %v3253_v62, %v5857_v56  ;;  %3275 = vst [vmem:[%s6049_s16] sm:$0x1f] %v3260_v27 }
 0x317   :  { %3276 = vst [vmem:[%s6049_s16 + $0x8] sm:$0x1f] %v3261_v11  ;;  %3277 = vst [vmem:[%s6049_s16 + $0x10] sm:$0x1f] %v3262_v13  ;;  %v3270_v55 = vsel %vm3259_vm2, %v3254_v48, %v5859_v57  ;;  %v3271_v56 = vsel %vm3259_vm2, %v3255_v53, %v5861_v37  ;;  %v3272_v26 = vsel %vm3259_vm2, %v3256_v24, %v5865_v61 }
 0x318   :  { %3278 = vst [vmem:[%s6049_s16 + $0x18] sm:$0x1f] %v3263_v6  ;;  %v3273_v31 = vsel %vm3259_vm2, %v3257_v25, %v5868_v1  ;;  %3279 = vst [vmem:[%s6049_s16 + $0x20] sm:$0x1f] %v3264_v16 }
 0x319   :  { %3280 = vst [vmem:[%s6049_s16 + $0x28] sm:$0x1f] %v3265_v18  ;;  %3283 = vst [vmem:[%s6049_s16 + $0x40] sm:$0x1f] %v3268_v49 }
 0x31a   :  { %3284 = vst [vmem:[%s6049_s16 + $0x48] sm:$0x1f] %v3269_v22  ;;  %3285 = vst [vmem:[%s6049_s16 + $0x50] sm:$0x1f] %v3270_v55 }
 0x31b   :  { %3286 = vst [vmem:[%s6049_s16 + $0x58] sm:$0x1f] %v3271_v56  ;;  %3287 = vst [vmem:[%s6049_s16 + $0x60] sm:$0x1f] %v3272_v26 }
 0x31c   :  { %3288 = vst [vmem:[%s6049_s16 + $0x68] sm:$0x1f] %v3273_v31 }
 0x31d   :  { %3295 = vsyncpa [#allocation3], 1 }
 0x31e   :  { %3296 = vsyncpa [#allocation5], 1 }

</bundles_post_ra>
